<compile_context>
chip_gen: v7x
topology: tpu7x:2x2x1
jax: 0.10.0
libtpu: 0.0.40
codegen_flags: <defaults>
</compile_context>

<pallas_src>
import functools

import jax
import jax.numpy as jnp
from jax import lax
from jax.experimental import pallas as pl
from jax.experimental.pallas import tpu as pltpu

VMEM = pltpu.MemorySpace.VMEM

# EUP approximate reciprocal in softmax: attention rows sum to ~1 (not exactly
# 1). Deliberate perf choice; set False to use an exact divide.
_APPROX_RECIP = True


# ------------------------------ helpers ------------------------------------

def _pick_tile(dim, target, align):
    """Largest `align`-multiple tile <= target that divides `dim`, else full dim."""
    if dim <= target:
        return dim
    t = (target // align) * align
    while t >= align:
        if dim % t == 0:
            return t
        t -= align
    return dim


def _activate(y, act):
    if act == "relu":
        return jnp.maximum(y, 0.0)
    if act == "gelu":
        # erf-based GELU (matches torch.nn.GELU default)
        return 0.5 * y * (1.0 + lax.erf(y * 0.7071067811865475))
    return y


def _recip(x):
    if _APPROX_RECIP:
        return pl.reciprocal(x, approx=True)
    return 1.0 / x


# --------------------------- tiled matmul kernels ----------------------------

def _matmul_1pass_kernel(x_ref, w_ref, b_ref, o_ref, *, act):
    # Full-K contraction in one shot: no accumulator round trip.
    y = jnp.dot(x_ref[...], w_ref[...], preferred_element_type=jnp.float32)
    y = y + b_ref[...]
    o_ref[...] = _activate(y, act).astype(o_ref.dtype)


def _matmul_kernel(x_ref, w_ref, b_ref, o_ref, acc_ref, *, act):
    k = pl.program_id(2)
    prod = jnp.dot(x_ref[...], w_ref[...], preferred_element_type=jnp.float32)

    @pl.when(k == 0)
    def _():
        acc_ref[...] = prod            # first step stores (no zero-then-add)

    @pl.when(k > 0)
    def _():
        acc_ref[...] += prod

    @pl.when(k == pl.num_programs(2) - 1)
    def _():
        y = acc_ref[...] + b_ref[...]
        o_ref[...] = _activate(y, act).astype(o_ref.dtype)


def matmul(x, w, b, act="none", out_dtype=jnp.bfloat16,
           tm=512, tn=512, tk=None):
    """Tiled x:[M,K] @ w:[K,N] + b:[N] with optional fused activation.

    tm is 16-aligned (bf16 sublane pairs). If K <= 1024 the reduction axis is
    not gridded at all (tk = K).  Chip-specific tuning note: tn can be raised
    to 1024 on v6e (128 MiB VMEM); keep 512 on v7x (64 MiB VMEM).
    """
    M, K = x.shape
    N = w.shape[1]
    tm = _pick_tile(M, tm, 16)
    tn = _pick_tile(N, tn, 128)
    if tk is None:
        tk = K if K <= 1024 else _pick_tile(K, 512, 128)
    else:
        tk = _pick_tile(K, tk, 128)
    b2 = b.reshape(1, N)

    if tk == K:
        return pl.pallas_call(
            functools.partial(_matmul_1pass_kernel, act=act),
            out_shape=jax.ShapeDtypeStruct((M, N), out_dtype),
            grid=(M // tm, N // tn),
            in_specs=[pl.BlockSpec((tm, K), lambda i, j: (i, 0)),
                      pl.BlockSpec((K, tn), lambda i, j: (0, j)),
                      pl.BlockSpec((1, tn), lambda i, j: (0, j))],
            out_specs=pl.BlockSpec((tm, tn), lambda i, j: (i, j)),
            compiler_params=pltpu.CompilerParams(
                dimension_semantics=("parallel", "parallel")),
        )(x, w, b2)

    return pl.pallas_call(
        functools.partial(_matmul_kernel, act=act),
        out_shape=jax.ShapeDtypeStruct((M, N), out_dtype),
        grid=(M // tm, N // tn, K // tk),
        in_specs=[pl.BlockSpec((tm, tk), lambda i, j, k: (i, k)),
                  pl.BlockSpec((tk, tn), lambda i, j, k: (k, j)),
                  pl.BlockSpec((1, tn), lambda i, j, k: (0, j))],
        out_specs=pl.BlockSpec((tm, tn), lambda i, j, k: (i, j)),
        scratch_shapes=[pltpu.VMEM((tm, tn), jnp.float32)],
        compiler_params=pltpu.CompilerParams(
            dimension_semantics=("parallel", "parallel", "arbitrary")),
    )(x, w, b2)


# ---------------- matmul fused with bias + residual + LayerNorm -------------

def _matmul_res_ln_1pass_kernel(x_ref, w_ref, b_ref, r_ref, g_ref, bb_ref,
                                o_ref, *, eps):
    y = jnp.dot(x_ref[...], w_ref[...], preferred_element_type=jnp.float32)
    y = y + b_ref[...] + r_ref[...].astype(jnp.float32)
    mu = jnp.mean(y, axis=-1, keepdims=True)
    var = jnp.mean((y - mu) ** 2, axis=-1, keepdims=True)
    yn = (y - mu) * lax.rsqrt(var + eps)
    o_ref[...] = (yn * g_ref[...] + bb_ref[...]).astype(o_ref.dtype)


def _matmul_res_ln_kernel(x_ref, w_ref, b_ref, r_ref, g_ref, bb_ref,
                          o_ref, acc_ref, *, eps):
    k = pl.program_id(1)
    prod = jnp.dot(x_ref[...], w_ref[...], preferred_element_type=jnp.float32)

    @pl.when(k == 0)
    def _():
        acc_ref[...] = prod

    @pl.when(k > 0)
    def _():
        acc_ref[...] += prod

    @pl.when(k == pl.num_programs(1) - 1)
    def _():
        y = acc_ref[...] + b_ref[...] + r_ref[...].astype(jnp.float32)
        mu = jnp.mean(y, axis=-1, keepdims=True)
        var = jnp.mean((y - mu) ** 2, axis=-1, keepdims=True)
        yn = (y - mu) * lax.rsqrt(var + eps)
        o_ref[...] = (yn * g_ref[...] + bb_ref[...]).astype(o_ref.dtype)


def matmul_res_ln(x, w, b, res, gamma, beta, eps=1e-12,
                  out_dtype=jnp.bfloat16, tm=512, tk=None):
    """LayerNorm(x @ w + b + res), LN row spans full N so N is not tiled."""
    M, K = x.shape
    N = w.shape[1]
    tm = _pick_tile(M, tm, 16)
    if tk is None:
        tk = K if K <= 1024 else _pick_tile(K, 512, 128)
    else:
        tk = _pick_tile(K, tk, 128)
    args = (x, w, b.reshape(1, N), res, gamma.reshape(1, N), beta.reshape(1, N))

    if tk == K:
        return pl.pallas_call(
            functools.partial(_matmul_res_ln_1pass_kernel, eps=eps),
            out_shape=jax.ShapeDtypeStruct((M, N), out_dtype),
            grid=(M // tm,),
            in_specs=[pl.BlockSpec((tm, K), lambda i: (i, 0)),
                      pl.BlockSpec((K, N), lambda i: (0, 0)),
                      pl.BlockSpec((1, N), lambda i: (0, 0)),
                      pl.BlockSpec((tm, N), lambda i: (i, 0)),
                      pl.BlockSpec((1, N), lambda i: (0, 0)),
                      pl.BlockSpec((1, N), lambda i: (0, 0))],
            out_specs=pl.BlockSpec((tm, N), lambda i: (i, 0)),
            compiler_params=pltpu.CompilerParams(
                dimension_semantics=("parallel",)),
        )(*args)

    return pl.pallas_call(
        functools.partial(_matmul_res_ln_kernel, eps=eps),
        out_shape=jax.ShapeDtypeStruct((M, N), out_dtype),
        grid=(M // tm, K // tk),
        in_specs=[pl.BlockSpec((tm, tk), lambda i, k: (i, k)),
                  pl.BlockSpec((tk, N), lambda i, k: (k, 0)),
                  pl.BlockSpec((1, N), lambda i, k: (0, 0)),
                  pl.BlockSpec((tm, N), lambda i, k: (i, 0)),
                  pl.BlockSpec((1, N), lambda i, k: (0, 0)),
                  pl.BlockSpec((1, N), lambda i, k: (0, 0))],
        out_specs=pl.BlockSpec((tm, N), lambda i, k: (i, 0)),
        scratch_shapes=[pltpu.VMEM((tm, N), jnp.float32)],
        compiler_params=pltpu.CompilerParams(
            dimension_semantics=("parallel", "arbitrary")),
    )(*args)


# ----------------- embedding sum fused with LayerNorm ------------------------

def _embed_ln_kernel(word_ref, postok_ref, g_ref, b_ref, o_ref, *, eps):
    # word_ref: (1,S,H) bf16 gathered word embeddings; postok_ref: (S,H) bf16
    # (position + token-type); fused add avoids an f32 [B*S,H] HBM intermediate.
    x = word_ref[...].astype(jnp.float32) + postok_ref[...].astype(jnp.float32)
    mu = jnp.mean(x, axis=-1, keepdims=True)
    var = jnp.mean((x - mu) ** 2, axis=-1, keepdims=True)
    y = (x - mu) * lax.rsqrt(var + eps)
    o_ref[...] = (y * g_ref[...] + b_ref[...]).astype(o_ref.dtype)


def embed_layernorm(word, postok, gamma, beta, eps=1e-12,
                    out_dtype=jnp.bfloat16):
    B, S, H = word.shape
    return pl.pallas_call(
        functools.partial(_embed_ln_kernel, eps=eps),
        out_shape=jax.ShapeDtypeStruct((B, S, H), out_dtype),
        grid=(B,),
        in_specs=[pl.BlockSpec((1, S, H), lambda b: (b, 0, 0)),
                  pl.BlockSpec((S, H), lambda b: (0, 0)),
                  pl.BlockSpec((1, H), lambda b: (0, 0)),
                  pl.BlockSpec((1, H), lambda b: (0, 0))],
        out_specs=pl.BlockSpec((1, S, H), lambda b: (b, 0, 0)),
        compiler_params=pltpu.CompilerParams(
            dimension_semantics=("parallel",)),
    )(word, postok, gamma.reshape(1, H), beta.reshape(1, H))


# ------------------------------ attention kernel ----------------------------

def _attention_kernel(q_ref, kv_ref, bias_ref, o_ref, *, num_heads, hidden,
                      scale):
    # q_ref:   (1, tq, 3H)  this q-tile's rows of the fused QKV activations
    # kv_ref:  (1,  S, 3H)  full QKV block (resident across q-tiles)
    # bias_ref:(1, 1, S)    additive mask bias (f32)
    # o_ref:   (1, tq, H)   merged-head context for this q-tile
    H = hidden
    Dh = H // num_heads
    bias = bias_ref[0].astype(jnp.float32)                       # (1, S)

    for h in range(num_heads):
        q = q_ref[0, :, h * Dh:(h + 1) * Dh]                     # (tq, Dh)
        k = kv_ref[0, :, H + h * Dh:H + (h + 1) * Dh]            # (S, Dh)
        v = kv_ref[0, :, 2 * H + h * Dh:2 * H + (h + 1) * Dh]    # (S, Dh)

        s = lax.dot_general(q, k, (((1,), (1,)), ((), ())),
                            preferred_element_type=jnp.float32)  # (tq, S)
        s = s * scale + bias
        m = jnp.max(s, axis=-1, keepdims=True)
        p = jnp.exp(s - m)
        l = jnp.sum(p, axis=-1, keepdims=True)
        p = p * _recip(l)
        ctx = jnp.dot(p.astype(v.dtype), v,
                      preferred_element_type=jnp.float32)        # (tq, Dh)
        # Write this head's context straight into its output columns
        # (no concatenate copy).
        o_ref[0, :, h * Dh:(h + 1) * Dh] = ctx.astype(o_ref.dtype)


def attention(qkv3d, mask_bias, num_heads, tq=256):
    """qkv3d: [B, S, 3H] (Q|K|V concatenated), mask_bias: [B, 1, S] additive.

    Grid = (B, S//tq): q-tiled with the full KV block resident, so scores are
    (tq, S) per head instead of (S, S).  Both grid axes are parallel
    (megacore / v7x dual-TC friendly).
    """
    B, S, three_h = qkv3d.shape
    H = three_h // 3
    Dh = H // num_heads
    tq = _pick_tile(S, tq, 8)
    # TODO(synk): for very long S add a KV inner loop with running max/sum.
    return pl.pallas_call(
        functools.partial(_attention_kernel, num_heads=num_heads, hidden=H,
                          scale=1.0 / (Dh ** 0.5)),
        out_shape=jax.ShapeDtypeStruct((B, S, H), qkv3d.dtype),
        grid=(B, S // tq),
        in_specs=[pl.BlockSpec((1, tq, three_h), lambda b, qi: (b, qi, 0)),
                  pl.BlockSpec((1, S, three_h), lambda b, qi: (b, 0, 0)),
                  pl.BlockSpec((1, 1, S), lambda b, qi: (b, 0, 0))],
        out_specs=pl.BlockSpec((1, tq, H), lambda b, qi: (b, qi, 0)),
        compiler_params=pltpu.CompilerParams(
            dimension_semantics=("parallel", "parallel")),
    )(qkv3d, qkv3d, mask_bias)


# ----------------------------- fused dense head ------------------------------

def _head_kernel(*refs, n_layers, act):
    x_ref = refs[0]
    o_ref = refs[-1]
    x = x_ref[...].astype(jnp.float32)
    for i in range(n_layers):
        w = refs[1 + 2 * i][...].astype(jnp.float32)
        b = refs[2 + 2 * i][...]
        x = jnp.dot(x, w, preferred_element_type=jnp.float32) + b
        if i < n_layers - 1:
            x = _activate(x, act)
    o_ref[...] = x.astype(o_ref.dtype)


def dense_head(x, layers, act):
    """Whole classifier head ([H -> d1 -> ... -> dn]) in a single tiny kernel."""
    n = len(layers)
    args = [x]
    for w, b in layers:
        args += [w, b.reshape(1, -1)]
    n_out = layers[-1][0].shape[1]
    B = x.shape[0]
    return pl.pallas_call(
        functools.partial(_head_kernel, n_layers=n, act=act),
        out_shape=jax.ShapeDtypeStruct((B, n_out), jnp.float32),
        in_specs=[pl.BlockSpec(memory_space=VMEM)] * len(args),
        out_specs=pl.BlockSpec(memory_space=VMEM),
    )(*args)


# ------------------------------ BERT forward --------------------------------

def bert_layer(h, mask_bias, p, num_heads, B, S):
    H = h.shape[1]
    # Fused QKV projection: one [H, 3H] matmul.
    qkv = matmul(h, p["wqkv"], p["bqkv"])                        # [B*S, 3H] bf16
    ctx = attention(qkv.reshape(B, S, 3 * H), mask_bias, num_heads)
    # Output projection + residual + LayerNorm1 fused.
    h1 = matmul_res_ln(ctx.reshape(B * S, H), p["wo"], p["bo"],
                       h, p["ln1_g"], p["ln1_b"])
    # FFN1 + GELU.
    ff = matmul(h1, p["w1"], p["b1"], act="gelu")                # [B*S, 4H] bf16
    # FFN2 + residual + LayerNorm2 fused.
    h2 = matmul_res_ln(ff, p["w2"], p["b2"], h1, p["ln2_g"], p["ln2_b"])
    return h2


def bert_classifier_forward(params, input_ids, attention_mask, *,
                            num_heads, head_act):
    B, S = input_ids.shape
    H = params["word_emb"].shape[1]

    # Embedding gather (glue) in bf16; sum + LayerNorm fused in one kernel.
    word = jnp.take(params["word_emb"], input_ids, axis=0)        # [B,S,H] bf16
    postok = params["pos_emb"][:S] + params["type_emb"][0][None, :]  # [S,H]
    h = embed_layernorm(word, postok, params["emb_ln_g"], params["emb_ln_b"])
    h = h.reshape(B * S, H)                                       # bf16

    # BERT-style additive attention mask, shaped [B, 1, S] (no per-head repeat).
    mask_bias = ((1.0 - attention_mask.astype(jnp.float32)) * -1e9
                 ).reshape(B, 1, S)

    for lp in params["layers"]:
        h = bert_layer(h, mask_bias, lp, num_heads, B, S)

    # last_hidden_state[:, 0, :].squeeze()
    cls = h.reshape(B, S, H)[:, 0, :]                             # [B,H]

    # Dense head: Linear -> act -> ... -> Linear (no act after last), fused.
    return dense_head(cls, params["head"], head_act)


# ------------------------------ Param setup ---------------------------------

def init_params(key, *, vocab, max_pos, type_vocab, hidden, num_layers,
                intermediate, dense_layers, wdtype=jnp.bfloat16):
    # TODO(synk): BertModel.from_pretrained checkpoint loading has no
    # in-script equivalent; weights here are deterministic random.
    keys = iter(jax.random.split(key, 16 * num_layers + 4 * len(dense_layers) + 16))

    def nrm(shape, scale=0.02):
        return scale * jax.random.normal(next(keys), shape, jnp.float32)

    params = {
        # Embedding tables kept in bf16 so the gather output is bf16 (halves
        # HBM traffic on the mem-bound embedding step).
        "word_emb": nrm((vocab, hidden)).astype(wdtype),
        "pos_emb": nrm((max_pos, hidden)).astype(wdtype),
        "type_emb": nrm((type_vocab, hidden)).astype(wdtype),
        "emb_ln_g": jnp.ones((hidden,), jnp.float32),
        "emb_ln_b": jnp.zeros((hidden,), jnp.float32),
        "layers": [],
        "head": [],
    }
    for _ in range(num_layers):
        wq, wk, wv = nrm((hidden, hidden)), nrm((hidden, hidden)), nrm((hidden, hidden))
        params["layers"].append({
            # Fused QKV weight [H, 3H] in bf16 for the MXU.
            "wqkv": jnp.concatenate([wq, wk, wv], axis=1).astype(wdtype),
            "bqkv": jnp.zeros((3 * hidden,), jnp.float32),
            "wo": nrm((hidden, hidden)).astype(wdtype),
            "bo": jnp.zeros((hidden,), jnp.float32),
            "ln1_g": jnp.ones((hidden,), jnp.float32),
            "ln1_b": jnp.zeros((hidden,), jnp.float32),
            "w1": nrm((hidden, intermediate)).astype(wdtype),
            "b1": jnp.zeros((intermediate,), jnp.float32),
            "w2": nrm((intermediate, hidden)).astype(wdtype),
            "b2": jnp.zeros((hidden,), jnp.float32),
            "ln2_g": jnp.ones((hidden,), jnp.float32),
            "ln2_b": jnp.zeros((hidden,), jnp.float32),
        })
    in_dim = hidden
    for d in dense_layers:
        params["head"].append((nrm((in_dim, d)), jnp.zeros((d,), jnp.float32)))
        in_dim = d
    return params


# --------------------------------- Main --------------------------------------

if __name__ == "__main__":
    # Small synthetic "BERT" config (deterministic random weights).
    BATCH, SEQ = 2, 8
    HIDDEN, HEADS, LAYERS, INTER = 32, 2, 2, 64
    VOCAB, MAX_POS, TYPE_VOCAB = 100, 16, 2
    DENSE_LAYERS = [16, 4]            # model_config['dense_layers'] = "16,4"
    HEAD_ACT = "gelu"                 # model_config['act'] = 'gelu'

    root = jax.random.PRNGKey(0)
    k_params, k_ids = jax.random.split(root)
    params = init_params(k_params, vocab=VOCAB, max_pos=MAX_POS,
                         type_vocab=TYPE_VOCAB, hidden=HIDDEN,
                         num_layers=LAYERS, intermediate=INTER,
                         dense_layers=DENSE_LAYERS)

    input_ids = jax.random.randint(k_ids, (BATCH, SEQ), 0, VOCAB, dtype=jnp.int32)
    attention_mask = jnp.ones((BATCH, SEQ), jnp.int32).at[:, SEQ - 2:].set(0)

    fwd = jax.jit(functools.partial(bert_classifier_forward,
                                    num_heads=HEADS, head_act=HEAD_ACT))
    out = fwd(params, input_ids, attention_mask)
    jax.block_until_ready(out)
    assert out.shape == (BATCH, DENSE_LAYERS[-1])
    assert bool(jnp.all(jnp.isfinite(out)))
    print("KERNEL_OK")
</pallas_src>

<mosaic_0001>
module attributes {stable_mosaic.version = 11 : i64} {
  func.func @_embed_ln_kernel(%arg0: i32, %arg1: memref<1x8x32xbf16, #tpu.memory_space<vmem>>, %arg2: memref<8x32xbf16, #tpu.memory_space<vmem>>, %arg3: memref<1x32xf32, #tpu.memory_space<vmem>>, %arg4: memref<1x32xf32, #tpu.memory_space<vmem>>, %arg5: memref<1x8x32xbf16, #tpu.memory_space<vmem>>) attributes {dimension_semantics = [#tpu.dimension_semantics<parallel>], iteration_bounds = array<i64: 2>, scalar_prefetch = 0 : i64, scratch_operands = 0 : i64, tpu.core_type = #tpu.core_type<tc>, window_params = [{transform_indices = @transform_0, window_bounds = array<i64: 1, 8, 32>}, {pipeline_mode = #tpu.pipeline_mode<synchronous>, transform_indices = @transform_1, window_bounds = array<i64: 8, 32>}, {pipeline_mode = #tpu.pipeline_mode<synchronous>, transform_indices = @transform_2, window_bounds = array<i64: 1, 32>}, {pipeline_mode = #tpu.pipeline_mode<synchronous>, transform_indices = @transform_3, window_bounds = array<i64: 1, 32>}, {transform_indices = @transform_4, window_bounds = array<i64: 1, 8, 32>}]} {
    %c0 = arith.constant 0 : index
    %c0_0 = arith.constant 0 : index
    %c0_1 = arith.constant 0 : index
    %0 = vector.load %arg1[%c0, %c0_0, %c0_1] : memref<1x8x32xbf16, #tpu.memory_space<vmem>>, vector<1x8x32xbf16>
    %1 = arith.extf %0 : vector<1x8x32xbf16> to vector<1x8x32xf32>
    %c0_2 = arith.constant 0 : index
    %c0_3 = arith.constant 0 : index
    %2 = vector.load %arg2[%c0_2, %c0_3] : memref<8x32xbf16, #tpu.memory_space<vmem>>, vector<8x32xbf16>
    %3 = arith.extf %2 : vector<8x32xbf16> to vector<8x32xf32>
    %4 = vector.shape_cast %3 : vector<8x32xf32> to vector<1x8x32xf32>
    %5 = arith.addf %1, %4 : vector<1x8x32xf32>
    %cst = arith.constant dense<0.000000e+00> : vector<1x8xf32>
    %6 = vector.multi_reduction <add>, %5, %cst [2] : vector<1x8x32xf32> to vector<1x8xf32>
    %7 = vector.shape_cast %6 : vector<1x8xf32> to vector<1x8x1xf32>
    %cst_4 = arith.constant 3.200000e+01 : f32
    %8 = vector.broadcast %cst_4 : f32 to vector<1x8x1xf32>
    %9 = arith.divf %7, %8 : vector<1x8x1xf32>
    %10 = vector.broadcast %9 : vector<1x8x1xf32> to vector<1x8x32xf32>
    %11 = arith.subf %5, %10 : vector<1x8x32xf32>
    %12 = arith.mulf %11, %11 : vector<1x8x32xf32>
    %cst_5 = arith.constant dense<0.000000e+00> : vector<1x8xf32>
    %13 = vector.multi_reduction <add>, %12, %cst_5 [2] : vector<1x8x32xf32> to vector<1x8xf32>
    %14 = vector.shape_cast %13 : vector<1x8xf32> to vector<1x8x1xf32>
    %cst_6 = arith.constant 3.200000e+01 : f32
    %15 = vector.broadcast %cst_6 : f32 to vector<1x8x1xf32>
    %16 = arith.divf %14, %15 : vector<1x8x1xf32>
    %17 = vector.broadcast %9 : vector<1x8x1xf32> to vector<1x8x32xf32>
    %18 = arith.subf %5, %17 : vector<1x8x32xf32>
    %cst_7 = arith.constant 9.99999996E-13 : f32
    %19 = vector.broadcast %cst_7 : f32 to vector<1x8x1xf32>
    %20 = arith.addf %16, %19 : vector<1x8x1xf32>
    %21 = math.rsqrt %20 : vector<1x8x1xf32>
    %22 = vector.broadcast %21 : vector<1x8x1xf32> to vector<1x8x32xf32>
    %23 = arith.mulf %18, %22 : vector<1x8x32xf32>
    %c0_8 = arith.constant 0 : index
    %c0_9 = arith.constant 0 : index
    %24 = vector.load %arg3[%c0_8, %c0_9] : memref<1x32xf32, #tpu.memory_space<vmem>>, vector<1x32xf32>
    %25 = vector.shape_cast %24 : vector<1x32xf32> to vector<1x1x32xf32>
    %26 = vector.broadcast %25 : vector<1x1x32xf32> to vector<1x8x32xf32>
    %27 = arith.mulf %23, %26 : vector<1x8x32xf32>
    %c0_10 = arith.constant 0 : index
    %c0_11 = arith.constant 0 : index
    %28 = vector.load %arg4[%c0_10, %c0_11] : memref<1x32xf32, #tpu.memory_space<vmem>>, vector<1x32xf32>
    %29 = vector.shape_cast %28 : vector<1x32xf32> to vector<1x1x32xf32>
    %30 = vector.broadcast %29 : vector<1x1x32xf32> to vector<1x8x32xf32>
    %31 = arith.addf %27, %30 : vector<1x8x32xf32>
    %32 = arith.truncf %31 : vector<1x8x32xf32> to vector<1x8x32xbf16>
    %c0_12 = arith.constant 0 : index
    %c0_13 = arith.constant 0 : index
    %c0_14 = arith.constant 0 : index
    %33 = vector.load %arg5[%c0_12, %c0_13, %c0_14] : memref<1x8x32xbf16, #tpu.memory_space<vmem>>, vector<1x8x32xbf16>
    tpu.vector_store %arg5[%c0_12, %c0_13, %c0_14], %32 {strides = array<i32>} : memref<1x8x32xbf16, #tpu.memory_space<vmem>>, vector<1x8x32xbf16>,
    return
  }
  func.func @transform_0(%arg0: i32) -> (i32, i32, i32) {
    %c0_i32 = arith.constant 0 : i32
    %c0_i32_0 = arith.constant 0 : i32
    %c0_i32_1 = arith.constant 0 : i32
    return %arg0, %c0_i32, %c0_i32_0 : i32, i32, i32
  }
  func.func @transform_1(%arg0: i32) -> (i32, i32) {
    %c0_i32 = arith.constant 0 : i32
    %c0_i32_0 = arith.constant 0 : i32
    %c0_i32_1 = arith.constant 0 : i32
    return %c0_i32, %c0_i32_0 : i32, i32
  }
  func.func @transform_2(%arg0: i32) -> (i32, i32) {
    %c0_i32 = arith.constant 0 : i32
    %c0_i32_0 = arith.constant 0 : i32
    %c0_i32_1 = arith.constant 0 : i32
    return %c0_i32, %c0_i32_0 : i32, i32
  }
  func.func @transform_3(%arg0: i32) -> (i32, i32) {
    %c0_i32 = arith.constant 0 : i32
    %c0_i32_0 = arith.constant 0 : i32
    %c0_i32_1 = arith.constant 0 : i32
    return %c0_i32, %c0_i32_0 : i32, i32
  }
  func.func @transform_4(%arg0: i32) -> (i32, i32, i32) {
    %c0_i32 = arith.constant 0 : i32
    %c0_i32_0 = arith.constant 0 : i32
    %c0_i32_1 = arith.constant 0 : i32
    return %arg0, %c0_i32, %c0_i32_0 : i32, i32, i32
  }
}

module attributes {stable_mosaic.version = 11 : i64} {
  func.func @_matmul_res_ln_1pass_kernel(%arg0: i32, %arg1: memref<16x32xbf16, #tpu.memory_space<vmem>>, %arg2: memref<32x32xbf16, #tpu.memory_space<vmem>>, %arg3: memref<1x32xf32, #tpu.memory_space<vmem>>, %arg4: memref<16x32xbf16, #tpu.memory_space<vmem>>, %arg5: memref<1x32xf32, #tpu.memory_space<vmem>>, %arg6: memref<1x32xf32, #tpu.memory_space<vmem>>, %arg7: memref<16x32xbf16, #tpu.memory_space<vmem>>) attributes {dimension_semantics = [#tpu.dimension_semantics<parallel>], iteration_bounds = array<i64: 1>, scalar_prefetch = 0 : i64, scratch_operands = 0 : i64, tpu.core_type = #tpu.core_type<tc>, window_params = [{transform_indices = @transform_0, window_bounds = array<i64: 16, 32>}, {pipeline_mode = #tpu.pipeline_mode<synchronous>, transform_indices = @transform_1, window_bounds = array<i64: 32, 32>}, {pipeline_mode = #tpu.pipeline_mode<synchronous>, transform_indices = @transform_2, window_bounds = array<i64: 1, 32>}, {transform_indices = @transform_3, window_bounds = array<i64: 16, 32>}, {pipeline_mode = #tpu.pipeline_mode<synchronous>, transform_indices = @transform_4, window_bounds = array<i64: 1, 32>}, {pipeline_mode = #tpu.pipeline_mode<synchronous>, transform_indices = @transform_5, window_bounds = array<i64: 1, 32>}, {transform_indices = @transform_6, window_bounds = array<i64: 16, 32>}]} {
    %c0 = arith.constant 0 : index
    %c0_0 = arith.constant 0 : index
    %0 = vector.load %arg1[%c0, %c0_0] : memref<16x32xbf16, #tpu.memory_space<vmem>>, vector<16x32xbf16>
    %c0_1 = arith.constant 0 : index
    %c0_2 = arith.constant 0 : index
    %1 = vector.load %arg2[%c0_1, %c0_2] : memref<32x32xbf16, #tpu.memory_space<vmem>>, vector<32x32xbf16>
    %cst = arith.constant dense<0.000000e+00> : vector<16x32xf32>
    %2 = tpu.matmul %0, %1, %cst {dimension_numbers = #tpu.dot_dimension_numbers<[1], [0], [0], [1], [0, 0, 1, 1], [], []>} : vector<16x32xbf16>, vector<32x32xbf16>, vector<16x32xf32> -> vector<16x32xf32>
    %c0_3 = arith.constant 0 : index
    %c0_4 = arith.constant 0 : index
    %3 = vector.load %arg3[%c0_3, %c0_4] : memref<1x32xf32, #tpu.memory_space<vmem>>, vector<1x32xf32>
    %4 = vector.broadcast %3 : vector<1x32xf32> to vector<16x32xf32>
    %5 = arith.addf %2, %4 : vector<16x32xf32>
    %c0_5 = arith.constant 0 : index
    %c0_6 = arith.constant 0 : index
    %6 = vector.load %arg4[%c0_5, %c0_6] : memref<16x32xbf16, #tpu.memory_space<vmem>>, vector<16x32xbf16>
    %7 = arith.extf %6 : vector<16x32xbf16> to vector<16x32xf32>
    %8 = arith.addf %5, %7 : vector<16x32xf32>
    %cst_7 = arith.constant dense<0.000000e+00> : vector<16xf32>
    %9 = vector.multi_reduction <add>, %8, %cst_7 [1] : vector<16x32xf32> to vector<16xf32>
    %10 = vector.shape_cast %9 : vector<16xf32> to vector<16x1xf32>
    %cst_8 = arith.constant 3.200000e+01 : f32
    %11 = vector.broadcast %cst_8 : f32 to vector<16x1xf32>
    %12 = arith.divf %10, %11 : vector<16x1xf32>
    %13 = vector.broadcast %12 : vector<16x1xf32> to vector<16x32xf32>
    %14 = arith.subf %8, %13 : vector<16x32xf32>
    %15 = arith.mulf %14, %14 : vector<16x32xf32>
    %cst_9 = arith.constant dense<0.000000e+00> : vector<16xf32>
    %16 = vector.multi_reduction <add>, %15, %cst_9 [1] : vector<16x32xf32> to vector<16xf32>
    %17 = vector.shape_cast %16 : vector<16xf32> to vector<16x1xf32>
    %cst_10 = arith.constant 3.200000e+01 : f32
    %18 = vector.broadcast %cst_10 : f32 to vector<16x1xf32>
    %19 = arith.divf %17, %18 : vector<16x1xf32>
    %20 = vector.broadcast %12 : vector<16x1xf32> to vector<16x32xf32>
    %21 = arith.subf %8, %20 : vector<16x32xf32>
    %cst_11 = arith.constant 9.99999996E-13 : f32
    %22 = vector.broadcast %cst_11 : f32 to vector<16x1xf32>
    %23 = arith.addf %19, %22 : vector<16x1xf32>
    %24 = math.rsqrt %23 : vector<16x1xf32>
    %25 = vector.broadcast %24 : vector<16x1xf32> to vector<16x32xf32>
    %26 = arith.mulf %21, %25 : vector<16x32xf32>
    %c0_12 = arith.constant 0 : index
    %c0_13 = arith.constant 0 : index
    %27 = vector.load %arg5[%c0_12, %c0_13] : memref<1x32xf32, #tpu.memory_space<vmem>>, vector<1x32xf32>
    %28 = vector.broadcast %27 : vector<1x32xf32> to vector<16x32xf32>
    %29 = arith.mulf %26, %28 : vector<16x32xf32>
    %c0_14 = arith.constant 0 : index
    %c0_15 = arith.constant 0 : index
    %30 = vector.load %arg6[%c0_14, %c0_15] : memref<1x32xf32, #tpu.memory_space<vmem>>, vector<1x32xf32>
    %31 = vector.broadcast %30 : vector<1x32xf32> to vector<16x32xf32>
    %32 = arith.addf %29, %31 : vector<16x32xf32>
    %33 = arith.truncf %32 : vector<16x32xf32> to vector<16x32xbf16>
    %c0_16 = arith.constant 0 : index
    %c0_17 = arith.constant 0 : index
    %34 = vector.load %arg7[%c0_16, %c0_17] : memref<16x32xbf16, #tpu.memory_space<vmem>>, vector<16x32xbf16>
    tpu.vector_store %arg7[%c0_16, %c0_17], %33 {strides = array<i32>} : memref<16x32xbf16, #tpu.memory_space<vmem>>, vector<16x32xbf16>,
    return
  }
  func.func @transform_0(%arg0: i32) -> (i32, i32) {
    %c0_i32 = arith.constant 0 : i32
    %c0_i32_0 = arith.constant 0 : i32
    return %arg0, %c0_i32 : i32, i32
  }
  func.func @transform_1(%arg0: i32) -> (i32, i32) {
    %c0_i32 = arith.constant 0 : i32
    %c0_i32_0 = arith.constant 0 : i32
    %c0_i32_1 = arith.constant 0 : i32
    return %c0_i32, %c0_i32_0 : i32, i32
  }
  func.func @transform_2(%arg0: i32) -> (i32, i32) {
    %c0_i32 = arith.constant 0 : i32
    %c0_i32_0 = arith.constant 0 : i32
    %c0_i32_1 = arith.constant 0 : i32
    return %c0_i32, %c0_i32_0 : i32, i32
  }
  func.func @transform_3(%arg0: i32) -> (i32, i32) {
    %c0_i32 = arith.constant 0 : i32
    %c0_i32_0 = arith.constant 0 : i32
    return %arg0, %c0_i32 : i32, i32
  }
  func.func @transform_4(%arg0: i32) -> (i32, i32) {
    %c0_i32 = arith.constant 0 : i32
    %c0_i32_0 = arith.constant 0 : i32
    %c0_i32_1 = arith.constant 0 : i32
    return %c0_i32, %c0_i32_0 : i32, i32
  }
  func.func @transform_5(%arg0: i32) -> (i32, i32) {
    %c0_i32 = arith.constant 0 : i32
    %c0_i32_0 = arith.constant 0 : i32
    %c0_i32_1 = arith.constant 0 : i32
    return %c0_i32, %c0_i32_0 : i32, i32
  }
  func.func @transform_6(%arg0: i32) -> (i32, i32) {
    %c0_i32 = arith.constant 0 : i32
    %c0_i32_0 = arith.constant 0 : i32
    return %arg0, %c0_i32 : i32, i32
  }
}

module attributes {stable_mosaic.version = 11 : i64} {
  func.func @_matmul_1pass_kernel(%arg0: i32, %arg1: i32, %arg2: memref<16x32xbf16, #tpu.memory_space<vmem>>, %arg3: memref<32x96xbf16, #tpu.memory_space<vmem>>, %arg4: memref<1x96xf32, #tpu.memory_space<vmem>>, %arg5: memref<16x96xbf16, #tpu.memory_space<vmem>>) attributes {dimension_semantics = [#tpu.dimension_semantics<parallel>, #tpu.dimension_semantics<parallel>], iteration_bounds = array<i64: 1, 1>, scalar_prefetch = 0 : i64, scratch_operands = 0 : i64, tpu.core_type = #tpu.core_type<tc>, window_params = [{transform_indices = @transform_0, window_bounds = array<i64: 16, 32>}, {transform_indices = @transform_1, window_bounds = array<i64: 32, 96>}, {transform_indices = @transform_2, window_bounds = array<i64: 1, 96>}, {transform_indices = @transform_3, window_bounds = array<i64: 16, 96>}]} {
    %c0 = arith.constant 0 : index
    %c0_0 = arith.constant 0 : index
    %0 = vector.load %arg2[%c0, %c0_0] : memref<16x32xbf16, #tpu.memory_space<vmem>>, vector<16x32xbf16>
    %c0_1 = arith.constant 0 : index
    %c0_2 = arith.constant 0 : index
    %1 = vector.load %arg3[%c0_1, %c0_2] : memref<32x96xbf16, #tpu.memory_space<vmem>>, vector<32x96xbf16>
    %cst = arith.constant dense<0.000000e+00> : vector<16x96xf32>
    %2 = tpu.matmul %0, %1, %cst {dimension_numbers = #tpu.dot_dimension_numbers<[1], [0], [0], [1], [0, 0, 1, 1], [], []>} : vector<16x32xbf16>, vector<32x96xbf16>, vector<16x96xf32> -> vector<16x96xf32>
    %c0_3 = arith.constant 0 : index
    %c0_4 = arith.constant 0 : index
    %3 = vector.load %arg4[%c0_3, %c0_4] : memref<1x96xf32, #tpu.memory_space<vmem>>, vector<1x96xf32>
    %4 = vector.broadcast %3 : vector<1x96xf32> to vector<16x96xf32>
    %5 = arith.addf %2, %4 : vector<16x96xf32>
    %6 = arith.truncf %5 : vector<16x96xf32> to vector<16x96xbf16>
    %c0_5 = arith.constant 0 : index
    %c0_6 = arith.constant 0 : index
    %7 = vector.load %arg5[%c0_5, %c0_6] : memref<16x96xbf16, #tpu.memory_space<vmem>>, vector<16x96xbf16>
    tpu.vector_store %arg5[%c0_5, %c0_6], %6 {strides = array<i32>} : memref<16x96xbf16, #tpu.memory_space<vmem>>, vector<16x96xbf16>,
    return
  }
  func.func @transform_0(%arg0: i32, %arg1: i32) -> (i32, i32) {
    %c0_i32 = arith.constant 0 : i32
    %c0_i32_0 = arith.constant 0 : i32
    return %arg0, %c0_i32 : i32, i32
  }
  func.func @transform_1(%arg0: i32, %arg1: i32) -> (i32, i32) {
    %c0_i32 = arith.constant 0 : i32
    %c0_i32_0 = arith.constant 0 : i32
    return %c0_i32, %arg1 : i32, i32
  }
  func.func @transform_2(%arg0: i32, %arg1: i32) -> (i32, i32) {
    %c0_i32 = arith.constant 0 : i32
    %c0_i32_0 = arith.constant 0 : i32
    return %c0_i32, %arg1 : i32, i32
  }
  func.func @transform_3(%arg0: i32, %arg1: i32) -> (i32, i32) {
    %c0_i32 = arith.constant 0 : i32
    return %arg0, %arg1 : i32, i32
  }
}

module attributes {stable_mosaic.version = 11 : i64} {
  func.func @_attention_kernel(%arg0: i32, %arg1: i32, %arg2: memref<1x8x96xbf16, #tpu.memory_space<vmem>>, %arg3: memref<1x8x96xbf16, #tpu.memory_space<vmem>>, %arg4: memref<1x1x8xf32, #tpu.memory_space<vmem>>, %arg5: memref<1x8x32xbf16, #tpu.memory_space<vmem>>) attributes {dimension_semantics = [#tpu.dimension_semantics<parallel>, #tpu.dimension_semantics<parallel>], iteration_bounds = array<i64: 2, 1>, scalar_prefetch = 0 : i64, scratch_operands = 0 : i64, tpu.core_type = #tpu.core_type<tc>, window_params = [{transform_indices = @transform_0, window_bounds = array<i64: 1, 8, 96>}, {transform_indices = @transform_1, window_bounds = array<i64: 1, 8, 96>}, {transform_indices = @transform_2, window_bounds = array<i64: 1, 1, 8>}, {transform_indices = @transform_3, window_bounds = array<i64: 1, 8, 32>}]} {
    %c0 = arith.constant 0 : index
    %c0_0 = arith.constant 0 : index
    %c0_1 = arith.constant 0 : index
    %0 = vector.load %arg4[%c0, %c0_0, %c0_1] : memref<1x1x8xf32, #tpu.memory_space<vmem>>, vector<1x1x8xf32>
    %1 = vector.shape_cast %0 : vector<1x1x8xf32> to vector<1x8xf32>
    %c0_2 = arith.constant 0 : index
    %c0_3 = arith.constant 0 : index
    %c0_4 = arith.constant 0 : index
    %2 = vector.load %arg2[%c0_2, %c0_3, %c0_4] : memref<1x8x96xbf16, #tpu.memory_space<vmem>>, vector<1x8x16xbf16>
    %3 = vector.shape_cast %2 : vector<1x8x16xbf16> to vector<8x16xbf16>
    %c0_5 = arith.constant 0 : index
    %c0_6 = arith.constant 0 : index
    %c32 = arith.constant 32 : index
    %4 = vector.load %arg3[%c0_5, %c0_6, %c32] : memref<1x8x96xbf16, #tpu.memory_space<vmem>>, vector<1x8x16xbf16>
    %5 = vector.shape_cast %4 : vector<1x8x16xbf16> to vector<8x16xbf16>
    %c0_7 = arith.constant 0 : index
    %c0_8 = arith.constant 0 : index
    %c64 = arith.constant 64 : index
    %6 = vector.load %arg3[%c0_7, %c0_8, %c64] : memref<1x8x96xbf16, #tpu.memory_space<vmem>>, vector<1x8x16xbf16>
    %7 = vector.shape_cast %6 : vector<1x8x16xbf16> to vector<8x16xbf16>
    %cst = arith.constant dense<0.000000e+00> : vector<8x8xf32>
    %8 = tpu.matmul %3, %5, %cst {dimension_numbers = #tpu.dot_dimension_numbers<[1], [1], [0], [0], [0, 0, 1, 0], [], []>} : vector<8x16xbf16>, vector<8x16xbf16>, vector<8x8xf32> -> vector<8x8xf32>
    %cst_9 = arith.constant 2.500000e-01 : f32
    %9 = vector.broadcast %cst_9 : f32 to vector<8x8xf32>
    %10 = arith.mulf %8, %9 : vector<8x8xf32>
    %11 = vector.broadcast %1 : vector<1x8xf32> to vector<8x8xf32>
    %12 = arith.addf %10, %11 : vector<8x8xf32>
    %cst_10 = arith.constant dense<0xFF800000> : vector<8xf32>
    %13 = vector.multi_reduction <maximumf>, %12, %cst_10 [1] : vector<8x8xf32> to vector<8xf32>
    %14 = vector.shape_cast %13 : vector<8xf32> to vector<8x1xf32>
    %15 = vector.broadcast %14 : vector<8x1xf32> to vector<8x8xf32>
    %16 = arith.subf %12, %15 : vector<8x8xf32>
    %17 = math.exp %16 : vector<8x8xf32>
    %cst_11 = arith.constant dense<0.000000e+00> : vector<8xf32>
    %18 = vector.multi_reduction <add>, %17, %cst_11 [1] : vector<8x8xf32> to vector<8xf32>
    %19 = vector.shape_cast %18 : vector<8xf32> to vector<8x1xf32>
    %20 = tpu.reciprocal %19 {approx = true} : vector<8x1xf32> -> vector<8x1xf32>
    %21 = vector.broadcast %20 : vector<8x1xf32> to vector<8x8xf32>
    %22 = arith.mulf %17, %21 : vector<8x8xf32>
    %23 = arith.truncf %22 : vector<8x8xf32> to vector<8x8xbf16>
    %cst_12 = arith.constant dense<0.000000e+00> : vector<8x16xf32>
    %24 = tpu.matmul %23, %7, %cst_12 {dimension_numbers = #tpu.dot_dimension_numbers<[1], [0], [0], [1], [0, 0, 1, 1], [], []>} : vector<8x8xbf16>, vector<8x16xbf16>, vector<8x16xf32> -> vector<8x16xf32>
    %25 = arith.truncf %24 : vector<8x16xf32> to vector<8x16xbf16>
    %c0_13 = arith.constant 0 : index
    %c0_14 = arith.constant 0 : index
    %c0_15 = arith.constant 0 : index
    %26 = vector.load %arg5[%c0_13, %c0_14, %c0_15] : memref<1x8x32xbf16, #tpu.memory_space<vmem>>, vector<1x8x16xbf16>
    %27 = vector.shape_cast %26 : vector<1x8x16xbf16> to vector<8x16xbf16>
    %28 = vector.shape_cast %25 : vector<8x16xbf16> to vector<1x8x16xbf16>
    tpu.vector_store %arg5[%c0_13, %c0_14, %c0_15], %28 {strides = array<i32>} : memref<1x8x32xbf16, #tpu.memory_space<vmem>>, vector<1x8x16xbf16>,
    %c0_16 = arith.constant 0 : index
    %c0_17 = arith.constant 0 : index
    %c16 = arith.constant 16 : index
    %29 = vector.load %arg2[%c0_16, %c0_17, %c16] : memref<1x8x96xbf16, #tpu.memory_space<vmem>>, vector<1x8x16xbf16>
    %30 = vector.shape_cast %29 : vector<1x8x16xbf16> to vector<8x16xbf16>
    %c0_18 = arith.constant 0 : index
    %c0_19 = arith.constant 0 : index
    %c48 = arith.constant 48 : index
    %31 = vector.load %arg3[%c0_18, %c0_19, %c48] : memref<1x8x96xbf16, #tpu.memory_space<vmem>>, vector<1x8x16xbf16>
    %32 = vector.shape_cast %31 : vector<1x8x16xbf16> to vector<8x16xbf16>
    %c0_20 = arith.constant 0 : index
    %c0_21 = arith.constant 0 : index
    %c80 = arith.constant 80 : index
    %33 = vector.load %arg3[%c0_20, %c0_21, %c80] : memref<1x8x96xbf16, #tpu.memory_space<vmem>>, vector<1x8x16xbf16>
    %34 = vector.shape_cast %33 : vector<1x8x16xbf16> to vector<8x16xbf16>
    %cst_22 = arith.constant dense<0.000000e+00> : vector<8x8xf32>
    %35 = tpu.matmul %30, %32, %cst_22 {dimension_numbers = #tpu.dot_dimension_numbers<[1], [1], [0], [0], [0, 0, 1, 0], [], []>} : vector<8x16xbf16>, vector<8x16xbf16>, vector<8x8xf32> -> vector<8x8xf32>
    %cst_23 = arith.constant 2.500000e-01 : f32
    %36 = vector.broadcast %cst_23 : f32 to vector<8x8xf32>
    %37 = arith.mulf %35, %36 : vector<8x8xf32>
    %38 = vector.broadcast %1 : vector<1x8xf32> to vector<8x8xf32>
    %39 = arith.addf %37, %38 : vector<8x8xf32>
    %cst_24 = arith.constant dense<0xFF800000> : vector<8xf32>
    %40 = vector.multi_reduction <maximumf>, %39, %cst_24 [1] : vector<8x8xf32> to vector<8xf32>
    %41 = vector.shape_cast %40 : vector<8xf32> to vector<8x1xf32>
    %42 = vector.broadcast %41 : vector<8x1xf32> to vector<8x8xf32>
    %43 = arith.subf %39, %42 : vector<8x8xf32>
    %44 = math.exp %43 : vector<8x8xf32>
    %cst_25 = arith.constant dense<0.000000e+00> : vector<8xf32>
    %45 = vector.multi_reduction <add>, %44, %cst_25 [1] : vector<8x8xf32> to vector<8xf32>
    %46 = vector.shape_cast %45 : vector<8xf32> to vector<8x1xf32>
    %47 = tpu.reciprocal %46 {approx = true} : vector<8x1xf32> -> vector<8x1xf32>
    %48 = vector.broadcast %47 : vector<8x1xf32> to vector<8x8xf32>
    %49 = arith.mulf %44, %48 : vector<8x8xf32>
    %50 = arith.truncf %49 : vector<8x8xf32> to vector<8x8xbf16>
    %cst_26 = arith.constant dense<0.000000e+00> : vector<8x16xf32>
    %51 = tpu.matmul %50, %34, %cst_26 {dimension_numbers = #tpu.dot_dimension_numbers<[1], [0], [0], [1], [0, 0, 1, 1], [], []>} : vector<8x8xbf16>, vector<8x16xbf16>, vector<8x16xf32> -> vector<8x16xf32>
    %52 = arith.truncf %51 : vector<8x16xf32> to vector<8x16xbf16>
    %c0_27 = arith.constant 0 : index
    %c0_28 = arith.constant 0 : index
    %c16_29 = arith.constant 16 : index
    %53 = vector.load %arg5[%c0_27, %c0_28, %c16_29] : memref<1x8x32xbf16, #tpu.memory_space<vmem>>, vector<1x8x16xbf16>
    %54 = vector.shape_cast %53 : vector<1x8x16xbf16> to vector<8x16xbf16>
    %55 = vector.shape_cast %52 : vector<8x16xbf16> to vector<1x8x16xbf16>
    tpu.vector_store %arg5[%c0_27, %c0_28, %c16_29], %55 {strides = array<i32>} : memref<1x8x32xbf16, #tpu.memory_space<vmem>>, vector<1x8x16xbf16>,
    return
  }
  func.func @transform_0(%arg0: i32, %arg1: i32) -> (i32, i32, i32) {
    %c0_i32 = arith.constant 0 : i32
    %c0_i32_0 = arith.constant 0 : i32
    return %arg0, %arg1, %c0_i32 : i32, i32, i32
  }
  func.func @transform_1(%arg0: i32, %arg1: i32) -> (i32, i32, i32) {
    %c0_i32 = arith.constant 0 : i32
    %c0_i32_0 = arith.constant 0 : i32
    %c0_i32_1 = arith.constant 0 : i32
    return %arg0, %c0_i32, %c0_i32_0 : i32, i32, i32
  }
  func.func @transform_2(%arg0: i32, %arg1: i32) -> (i32, i32, i32) {
    %c0_i32 = arith.constant 0 : i32
    %c0_i32_0 = arith.constant 0 : i32
    %c0_i32_1 = arith.constant 0 : i32
    return %arg0, %c0_i32, %c0_i32_0 : i32, i32, i32
  }
  func.func @transform_3(%arg0: i32, %arg1: i32) -> (i32, i32, i32) {
    %c0_i32 = arith.constant 0 : i32
    %c0_i32_0 = arith.constant 0 : i32
    return %arg0, %arg1, %c0_i32 : i32, i32, i32
  }
}

module attributes {stable_mosaic.version = 11 : i64} {
  func.func @_matmul_1pass_kernel(%arg0: i32, %arg1: i32, %arg2: memref<16x32xbf16, #tpu.memory_space<vmem>>, %arg3: memref<32x64xbf16, #tpu.memory_space<vmem>>, %arg4: memref<1x64xf32, #tpu.memory_space<vmem>>, %arg5: memref<16x64xbf16, #tpu.memory_space<vmem>>) attributes {dimension_semantics = [#tpu.dimension_semantics<parallel>, #tpu.dimension_semantics<parallel>], iteration_bounds = array<i64: 1, 1>, scalar_prefetch = 0 : i64, scratch_operands = 0 : i64, tpu.core_type = #tpu.core_type<tc>, window_params = [{transform_indices = @transform_0, window_bounds = array<i64: 16, 32>}, {transform_indices = @transform_1, window_bounds = array<i64: 32, 64>}, {transform_indices = @transform_2, window_bounds = array<i64: 1, 64>}, {transform_indices = @transform_3, window_bounds = array<i64: 16, 64>}]} {
    %c0 = arith.constant 0 : index
    %c0_0 = arith.constant 0 : index
    %0 = vector.load %arg2[%c0, %c0_0] : memref<16x32xbf16, #tpu.memory_space<vmem>>, vector<16x32xbf16>
    %c0_1 = arith.constant 0 : index
    %c0_2 = arith.constant 0 : index
    %1 = vector.load %arg3[%c0_1, %c0_2] : memref<32x64xbf16, #tpu.memory_space<vmem>>, vector<32x64xbf16>
    %cst = arith.constant dense<0.000000e+00> : vector<16x64xf32>
    %2 = tpu.matmul %0, %1, %cst {dimension_numbers = #tpu.dot_dimension_numbers<[1], [0], [0], [1], [0, 0, 1, 1], [], []>} : vector<16x32xbf16>, vector<32x64xbf16>, vector<16x64xf32> -> vector<16x64xf32>
    %c0_3 = arith.constant 0 : index
    %c0_4 = arith.constant 0 : index
    %3 = vector.load %arg4[%c0_3, %c0_4] : memref<1x64xf32, #tpu.memory_space<vmem>>, vector<1x64xf32>
    %4 = vector.broadcast %3 : vector<1x64xf32> to vector<16x64xf32>
    %5 = arith.addf %2, %4 : vector<16x64xf32>
    %cst_5 = arith.constant 5.000000e-01 : f32
    %6 = vector.broadcast %cst_5 : f32 to vector<16x64xf32>
    %7 = arith.mulf %6, %5 : vector<16x64xf32>
    %cst_6 = arith.constant 0.707106769 : f32
    %8 = vector.broadcast %cst_6 : f32 to vector<16x64xf32>
    %9 = arith.mulf %5, %8 : vector<16x64xf32>
    %10 = math.erf %9 : vector<16x64xf32>
    %cst_7 = arith.constant 1.000000e+00 : f32
    %11 = vector.broadcast %cst_7 : f32 to vector<16x64xf32>
    %12 = arith.addf %11, %10 : vector<16x64xf32>
    %13 = arith.mulf %7, %12 : vector<16x64xf32>
    %14 = arith.truncf %13 : vector<16x64xf32> to vector<16x64xbf16>
    %c0_8 = arith.constant 0 : index
    %c0_9 = arith.constant 0 : index
    %15 = vector.load %arg5[%c0_8, %c0_9] : memref<16x64xbf16, #tpu.memory_space<vmem>>, vector<16x64xbf16>
    tpu.vector_store %arg5[%c0_8, %c0_9], %14 {strides = array<i32>} : memref<16x64xbf16, #tpu.memory_space<vmem>>, vector<16x64xbf16>,
    return
  }
  func.func @transform_0(%arg0: i32, %arg1: i32) -> (i32, i32) {
    %c0_i32 = arith.constant 0 : i32
    %c0_i32_0 = arith.constant 0 : i32
    return %arg0, %c0_i32 : i32, i32
  }
  func.func @transform_1(%arg0: i32, %arg1: i32) -> (i32, i32) {
    %c0_i32 = arith.constant 0 : i32
    %c0_i32_0 = arith.constant 0 : i32
    return %c0_i32, %arg1 : i32, i32
  }
  func.func @transform_2(%arg0: i32, %arg1: i32) -> (i32, i32) {
    %c0_i32 = arith.constant 0 : i32
    %c0_i32_0 = arith.constant 0 : i32
    return %c0_i32, %arg1 : i32, i32
  }
  func.func @transform_3(%arg0: i32, %arg1: i32) -> (i32, i32) {
    %c0_i32 = arith.constant 0 : i32
    return %arg0, %arg1 : i32, i32
  }
}

module attributes {stable_mosaic.version = 11 : i64} {
  func.func @_matmul_res_ln_1pass_kernel(%arg0: i32, %arg1: memref<16x64xbf16, #tpu.memory_space<vmem>>, %arg2: memref<64x32xbf16, #tpu.memory_space<vmem>>, %arg3: memref<1x32xf32, #tpu.memory_space<vmem>>, %arg4: memref<16x32xbf16, #tpu.memory_space<vmem>>, %arg5: memref<1x32xf32, #tpu.memory_space<vmem>>, %arg6: memref<1x32xf32, #tpu.memory_space<vmem>>, %arg7: memref<16x32xbf16, #tpu.memory_space<vmem>>) attributes {dimension_semantics = [#tpu.dimension_semantics<parallel>], iteration_bounds = array<i64: 1>, scalar_prefetch = 0 : i64, scratch_operands = 0 : i64, tpu.core_type = #tpu.core_type<tc>, window_params = [{transform_indices = @transform_0, window_bounds = array<i64: 16, 64>}, {pipeline_mode = #tpu.pipeline_mode<synchronous>, transform_indices = @transform_1, window_bounds = array<i64: 64, 32>}, {pipeline_mode = #tpu.pipeline_mode<synchronous>, transform_indices = @transform_2, window_bounds = array<i64: 1, 32>}, {transform_indices = @transform_3, window_bounds = array<i64: 16, 32>}, {pipeline_mode = #tpu.pipeline_mode<synchronous>, transform_indices = @transform_4, window_bounds = array<i64: 1, 32>}, {pipeline_mode = #tpu.pipeline_mode<synchronous>, transform_indices = @transform_5, window_bounds = array<i64: 1, 32>}, {transform_indices = @transform_6, window_bounds = array<i64: 16, 32>}]} {
    %c0 = arith.constant 0 : index
    %c0_0 = arith.constant 0 : index
    %0 = vector.load %arg1[%c0, %c0_0] : memref<16x64xbf16, #tpu.memory_space<vmem>>, vector<16x64xbf16>
    %c0_1 = arith.constant 0 : index
    %c0_2 = arith.constant 0 : index
    %1 = vector.load %arg2[%c0_1, %c0_2] : memref<64x32xbf16, #tpu.memory_space<vmem>>, vector<64x32xbf16>
    %cst = arith.constant dense<0.000000e+00> : vector<16x32xf32>
    %2 = tpu.matmul %0, %1, %cst {dimension_numbers = #tpu.dot_dimension_numbers<[1], [0], [0], [1], [0, 0, 1, 1], [], []>} : vector<16x64xbf16>, vector<64x32xbf16>, vector<16x32xf32> -> vector<16x32xf32>
    %c0_3 = arith.constant 0 : index
    %c0_4 = arith.constant 0 : index
    %3 = vector.load %arg3[%c0_3, %c0_4] : memref<1x32xf32, #tpu.memory_space<vmem>>, vector<1x32xf32>
    %4 = vector.broadcast %3 : vector<1x32xf32> to vector<16x32xf32>
    %5 = arith.addf %2, %4 : vector<16x32xf32>
    %c0_5 = arith.constant 0 : index
    %c0_6 = arith.constant 0 : index
    %6 = vector.load %arg4[%c0_5, %c0_6] : memref<16x32xbf16, #tpu.memory_space<vmem>>, vector<16x32xbf16>
    %7 = arith.extf %6 : vector<16x32xbf16> to vector<16x32xf32>
    %8 = arith.addf %5, %7 : vector<16x32xf32>
    %cst_7 = arith.constant dense<0.000000e+00> : vector<16xf32>
    %9 = vector.multi_reduction <add>, %8, %cst_7 [1] : vector<16x32xf32> to vector<16xf32>
    %10 = vector.shape_cast %9 : vector<16xf32> to vector<16x1xf32>
    %cst_8 = arith.constant 3.200000e+01 : f32
    %11 = vector.broadcast %cst_8 : f32 to vector<16x1xf32>
    %12 = arith.divf %10, %11 : vector<16x1xf32>
    %13 = vector.broadcast %12 : vector<16x1xf32> to vector<16x32xf32>
    %14 = arith.subf %8, %13 : vector<16x32xf32>
    %15 = arith.mulf %14, %14 : vector<16x32xf32>
    %cst_9 = arith.constant dense<0.000000e+00> : vector<16xf32>
    %16 = vector.multi_reduction <add>, %15, %cst_9 [1] : vector<16x32xf32> to vector<16xf32>
    %17 = vector.shape_cast %16 : vector<16xf32> to vector<16x1xf32>
    %cst_10 = arith.constant 3.200000e+01 : f32
    %18 = vector.broadcast %cst_10 : f32 to vector<16x1xf32>
    %19 = arith.divf %17, %18 : vector<16x1xf32>
    %20 = vector.broadcast %12 : vector<16x1xf32> to vector<16x32xf32>
    %21 = arith.subf %8, %20 : vector<16x32xf32>
    %cst_11 = arith.constant 9.99999996E-13 : f32
    %22 = vector.broadcast %cst_11 : f32 to vector<16x1xf32>
    %23 = arith.addf %19, %22 : vector<16x1xf32>
    %24 = math.rsqrt %23 : vector<16x1xf32>
    %25 = vector.broadcast %24 : vector<16x1xf32> to vector<16x32xf32>
    %26 = arith.mulf %21, %25 : vector<16x32xf32>
    %c0_12 = arith.constant 0 : index
    %c0_13 = arith.constant 0 : index
    %27 = vector.load %arg5[%c0_12, %c0_13] : memref<1x32xf32, #tpu.memory_space<vmem>>, vector<1x32xf32>
    %28 = vector.broadcast %27 : vector<1x32xf32> to vector<16x32xf32>
    %29 = arith.mulf %26, %28 : vector<16x32xf32>
    %c0_14 = arith.constant 0 : index
    %c0_15 = arith.constant 0 : index
    %30 = vector.load %arg6[%c0_14, %c0_15] : memref<1x32xf32, #tpu.memory_space<vmem>>, vector<1x32xf32>
    %31 = vector.broadcast %30 : vector<1x32xf32> to vector<16x32xf32>
    %32 = arith.addf %29, %31 : vector<16x32xf32>
    %33 = arith.truncf %32 : vector<16x32xf32> to vector<16x32xbf16>
    %c0_16 = arith.constant 0 : index
    %c0_17 = arith.constant 0 : index
    %34 = vector.load %arg7[%c0_16, %c0_17] : memref<16x32xbf16, #tpu.memory_space<vmem>>, vector<16x32xbf16>
    tpu.vector_store %arg7[%c0_16, %c0_17], %33 {strides = array<i32>} : memref<16x32xbf16, #tpu.memory_space<vmem>>, vector<16x32xbf16>,
    return
  }
  func.func @transform_0(%arg0: i32) -> (i32, i32) {
    %c0_i32 = arith.constant 0 : i32
    %c0_i32_0 = arith.constant 0 : i32
    return %arg0, %c0_i32 : i32, i32
  }
  func.func @transform_1(%arg0: i32) -> (i32, i32) {
    %c0_i32 = arith.constant 0 : i32
    %c0_i32_0 = arith.constant 0 : i32
    %c0_i32_1 = arith.constant 0 : i32
    return %c0_i32, %c0_i32_0 : i32, i32
  }
  func.func @transform_2(%arg0: i32) -> (i32, i32) {
    %c0_i32 = arith.constant 0 : i32
    %c0_i32_0 = arith.constant 0 : i32
    %c0_i32_1 = arith.constant 0 : i32
    return %c0_i32, %c0_i32_0 : i32, i32
  }
  func.func @transform_3(%arg0: i32) -> (i32, i32) {
    %c0_i32 = arith.constant 0 : i32
    %c0_i32_0 = arith.constant 0 : i32
    return %arg0, %c0_i32 : i32, i32
  }
  func.func @transform_4(%arg0: i32) -> (i32, i32) {
    %c0_i32 = arith.constant 0 : i32
    %c0_i32_0 = arith.constant 0 : i32
    %c0_i32_1 = arith.constant 0 : i32
    return %c0_i32, %c0_i32_0 : i32, i32
  }
  func.func @transform_5(%arg0: i32) -> (i32, i32) {
    %c0_i32 = arith.constant 0 : i32
    %c0_i32_0 = arith.constant 0 : i32
    %c0_i32_1 = arith.constant 0 : i32
    return %c0_i32, %c0_i32_0 : i32, i32
  }
  func.func @transform_6(%arg0: i32) -> (i32, i32) {
    %c0_i32 = arith.constant 0 : i32
    %c0_i32_0 = arith.constant 0 : i32
    return %arg0, %c0_i32 : i32, i32
  }
}

module attributes {stable_mosaic.version = 11 : i64} {
  func.func @_head_kernel(%arg0: memref<2x32xbf16, #tpu.memory_space<vmem>>, %arg1: memref<32x16xf32, #tpu.memory_space<vmem>>, %arg2: memref<1x16xf32, #tpu.memory_space<vmem>>, %arg3: memref<16x4xf32, #tpu.memory_space<vmem>>, %arg4: memref<1x4xf32, #tpu.memory_space<vmem>>, %arg5: memref<2x4xf32, #tpu.memory_space<vmem>>) attributes {dimension_semantics = [], scalar_prefetch = 0 : i64, scratch_operands = 0 : i64, tpu.core_type = #tpu.core_type<tc>} {
    %c0 = arith.constant 0 : index
    %c0_0 = arith.constant 0 : index
    %0 = vector.load %arg0[%c0, %c0_0] : memref<2x32xbf16, #tpu.memory_space<vmem>>, vector<2x32xbf16>
    %1 = arith.extf %0 : vector<2x32xbf16> to vector<2x32xf32>
    %c0_1 = arith.constant 0 : index
    %c0_2 = arith.constant 0 : index
    %2 = vector.load %arg1[%c0_1, %c0_2] : memref<32x16xf32, #tpu.memory_space<vmem>>, vector<32x16xf32>
    %c0_3 = arith.constant 0 : index
    %c0_4 = arith.constant 0 : index
    %3 = vector.load %arg2[%c0_3, %c0_4] : memref<1x16xf32, #tpu.memory_space<vmem>>, vector<1x16xf32>
    %cst = arith.constant dense<0.000000e+00> : vector<2x16xf32>
    %4 = tpu.matmul %1, %2, %cst {dimension_numbers = #tpu.dot_dimension_numbers<[1], [0], [0], [1], [0, 0, 1, 1], [], []>} : vector<2x32xf32>, vector<32x16xf32>, vector<2x16xf32> -> vector<2x16xf32>
    %5 = vector.broadcast %3 : vector<1x16xf32> to vector<2x16xf32>
    %6 = arith.addf %4, %5 : vector<2x16xf32>
    %cst_5 = arith.constant 5.000000e-01 : f32
    %7 = vector.broadcast %cst_5 : f32 to vector<2x16xf32>
    %8 = arith.mulf %7, %6 : vector<2x16xf32>
    %cst_6 = arith.constant 0.707106769 : f32
    %9 = vector.broadcast %cst_6 : f32 to vector<2x16xf32>
    %10 = arith.mulf %6, %9 : vector<2x16xf32>
    %11 = math.erf %10 : vector<2x16xf32>
    %cst_7 = arith.constant 1.000000e+00 : f32
    %12 = vector.broadcast %cst_7 : f32 to vector<2x16xf32>
    %13 = arith.addf %12, %11 : vector<2x16xf32>
    %14 = arith.mulf %8, %13 : vector<2x16xf32>
    %c0_8 = arith.constant 0 : index
    %c0_9 = arith.constant 0 : index
    %15 = vector.load %arg3[%c0_8, %c0_9] : memref<16x4xf32, #tpu.memory_space<vmem>>, vector<16x4xf32>
    %c0_10 = arith.constant 0 : index
    %c0_11 = arith.constant 0 : index
    %16 = vector.load %arg4[%c0_10, %c0_11] : memref<1x4xf32, #tpu.memory_space<vmem>>, vector<1x4xf32>
    %cst_12 = arith.constant dense<0.000000e+00> : vector<2x4xf32>
    %17 = tpu.matmul %14, %15, %cst_12 {dimension_numbers = #tpu.dot_dimension_numbers<[1], [0], [0], [1], [0, 0, 1, 1], [], []>} : vector<2x16xf32>, vector<16x4xf32>, vector<2x4xf32> -> vector<2x4xf32>
    %18 = vector.broadcast %16 : vector<1x4xf32> to vector<2x4xf32>
    %19 = arith.addf %17, %18 : vector<2x4xf32>
    %c0_13 = arith.constant 0 : index
    %c0_14 = arith.constant 0 : index
    %20 = vector.load %arg5[%c0_13, %c0_14] : memref<2x4xf32, #tpu.memory_space<vmem>>, vector<2x4xf32>
    tpu.vector_store %arg5[%c0_13, %c0_14], %19 {strides = array<i32>} : memref<2x4xf32, #tpu.memory_space<vmem>>, vector<2x4xf32>,
    return
  }
}

</mosaic_0001>

<bundles_post_ra>
// kernel: bert_classifier_forward.13
= control target key start
LH: loop header
LB: loop body
LE: loop exit
PB: predicated region body
PF: predicated region fallthrough
CT: control target
= control target key end

     0   :  { %v130_v0 = vmov 0.0   ;;  %vm131_vm0 = vmmov 0   ;;  %vm45_vm1 = vcmask 261120   ;;  %vm98_vm2 = vcmask 781312   ;;  %s170_s1 = inlined_call_operand.vmem [shape: bf16[32,96], index: 1, kind: input, shape index: {}]   ;;  %s171_s0 = inlined_call_operand.vmem [shape: bf16[16,32], index: 0, kind: input, shape index: {}]   ;;  %s172_s2 = inlined_call_operand.vmem [shape: f32[1,96], index: 2, kind: input, shape index: {}]   ;;  %s173_s3 = inlined_call_operand.vmem [shape: bf16[16,96], index: 3, kind: output, shape index: {}]  }
   0x1   :  { %117 = vmatprep.subr.bf16.mxu0 %v130_v0  ;;  %v127_v1 = vld [vmem:[%s170_s1] sm:$0xff]   ;;  %121 = vmatprep.mubr.msk.bf16.mxu0 %vm131_vm0, %v130_v0  ;;  %v128_v2 = vld [vmem:[%s170_s1 + $0x8] sm:$0xff]  }
   0x2   :  { %118 = vmatpush3.bf16.msra.mxu0 %v127_v1  ;;  %v129_v3 = vld [vmem:[%s171_s0] sm:$0xff]  }
   0x3   :  { %119 = vmatprep.subr.bf16.mxu0 %v130_v0  ;;  %v105_v4 = vld [vmem:[%s172_s2] ss:$0 sm:$0xff] }
   0x6   :  { %120 = vmatpush3.bf16.msra.mxu0 %v128_v2 }
   0x9   :  { %122 = vmatmul.mubr.msk.bf16.vlgmr.msra.gmra.mrb[0].mxu0 %vm45_vm1, %v129_v3 }
  0xdc   :  { %v83_v5 = vpop.f32.mrb[0].mxu0 }
  0xdd   :  { %v84_v6 = vadd.f32 %v105_v4, %v83_v5  ;;  %v123_v7 = vpop.f32.mrb[1].mxu0 }
  0xde   :  { %v86_v8 = vpop.f32.mrb[2].mxu0 }
  0xdf   :  { %v112_v9 = vpack.c.bf16 %v84_v6, %v84_v6  ;;  %v87_v10 = vadd.f32 %v105_v4, %v86_v8  ;;  %v124_v11 = vpop.f32.mrb[3].mxu0 }
  0xe1   :  { %99 = vst.msk [vmem:[%s173_s3] sm:$0xf] %vm98_vm2, %v112_v9  ;;  %v113_v12 = vpack.c.bf16 %v87_v10, %v87_v10 }
  0xe3   :  { %100 = vst.msk [vmem:[%s173_s3 + $0x4] sm:$0xf] %vm98_vm2, %v113_v12 }

// kernel: bert_classifier_forward.12
= control target key start
LH: loop header
LB: loop body
LE: loop exit
PB: predicated region body
PF: predicated region fallthrough
CT: control target
= control target key end

     0   :  { %s339_s15 = smov 0   ;;  %s365_s0 = inlined_call_operand.vmem [shape: bf16[2,8,32], index: 0, kind: input, shape index: {}]   ;;  %s366_s1 = inlined_call_operand.vmem [shape: bf16[8,32], index: 1, kind: input, shape index: {}]   ;;  %s367_s2 = inlined_call_operand.vmem [shape: f32[1,32], index: 2, kind: input, shape index: {}]   ;;  %s368_s3 = inlined_call_operand.vmem [shape: f32[1,32], index: 3, kind: input, shape index: {}]   ;;  %s369_s4 = inlined_call_operand.vmem [shape: bf16[2,8,32], index: 4, kind: output, shape index: {}]  }
   0x1 LB: > { %s285_s16 = sadd.s32 4294967295, %s312_s15   ;;  %p289_p0 = scmp.ge.s32.totalorder %s312_s15, 1  ;;  %s312_s15 = sphi %s339_s15, %s14_s15  }
   0x2   : > { %p161_p1 = scmp.lt.s32.totalorder %s312_s15, 3 }
   0x4   : > { %p162_p2 = pnand %p289_p0, %p161_p1 }
   0x5   : > { %p185_p3 = scmp.lt.s32.totalorder (!%p162_p2), %s285_s16, 1  ;;  %v195_v0 = vld [vmem:[%s366_s1] sm:$0xf] (!%p162_p2)  ;;  %vm198_vm0 = vcmask (!%p162_p2), 261120   ;;  %vm230_vm1 = vcmask (!%p162_p2), 257024  }
   0x6   : > { %165 = sbr.rel (%p162_p2) target bundleno = 337 (0x151), region = 36  ;;  %v196_v1 = vunpack.c.l.bf16 (!%p162_p2), %v195_v0  ;;  %v292_v15 = vld [vmem:[%s367_s2] ss:$0 sm:$0xff] (!%p162_p2) }
   0x7   : > { %v293_v17 = vld [vmem:[%s368_s3] ss:$0 sm:$0xff] (!%p162_p2) }
   0xd   : > { %s371_s16 = smov (!%p185_p3, %s285_s16), 1 }
   0xe   : > { %s290_s19 = sshll.u32 %s371_s16, 2 }
   0xf   : > { %s188_s22 = scalar_lea.vmem %s365_s0, %s290_s19  ;;  %s192_s29 = scalar_lea.vmem %s369_s4, %s290_s19 }
  0x10   : > { %v193_v2 = vld [vmem:[%s188_s22] sm:$0xf] }
  0x11   : > { %v194_v3 = vunpack.c.l.bf16 %v193_v2 }
  0x13   : > { %v197_v4 = vadd.f32 %v196_v1, %v194_v3 }
  0x15   : > { %v199_v5 = vsel %vm198_vm0, %v197_v4, 0.0 }
  0x16   : > { %200 = vadd.xlane.f32.xlu0 %v199_v5 }
  0xa3   : > { %v201_v6 = vpop.xlane.xlu0 %200 }
  0xa4   : > { %v203_v7 = vmul.f32 0.03125, %v201_v6 }
  0xa6   : > { %v204_v8 = vsub.f32 %v197_v4, %v203_v7 }
  0xa8   : > { %v205_v9 = vmul.f32 %v204_v8, %v204_v8 }
  0xaa   : > { %v206_v10 = vsel %vm198_vm0, %v205_v9, 0.0 }
  0xab   : > { %207 = vadd.xlane.f32.xlu0 %v206_v10 }
 0x138   : > { %v208_v11 = vpop.xlane.xlu0 %207 }
 0x139   : > { %v209_v12 = vmul.f32 0.03125, %v208_v11 }
 0x13b   : > { %v210_v13 = vadd.f32 1e-12, %v209_v12 }
 0x13d   : > { %304 = vrsqrt.f32 %v210_v13 }
 0x147   : > { %v305_v14 = vpop.eup %304 }
 0x148   : > { %v212_v16 = vmul.f32 %v305_v14, %v204_v8 }
 0x14a   : > { %v220_v18 = vmul.f32 %v292_v15, %v212_v16 }
 0x14c   : > { %v228_v19 = vadd.f32 %v293_v17, %v220_v18 }
 0x14e   : > { %v229_v20 = vpack.c.bf16 %v228_v19, %v228_v19 }
 0x150   : > { %231 = vst.msk [vmem:[%s192_s29] sm:$0xf] %vm230_vm1, %v229_v20 }
 0x151 PF: > { %s14_s15 = sadd.s32 1, %s312_s15  }
 0x152   : > { %p11_p4 = scmp.ge.s32.totalorder %s14_s15, 4  }
 0x154   :  { %13 = sbr.rel (!%p11_p4) target bundleno = 1 (0x1), region = 66 }

// kernel: bert_classifier_forward.15
= control target key start
LH: loop header
LB: loop body
LE: loop exit
PB: predicated region body
PF: predicated region fallthrough
CT: control target
= control target key end

     0   :  { %v200_v0 = vmov 0.0   ;;  %vm201_vm0 = vmmov 0   ;;  %vm54_vm1 = vcmask 261120   ;;  %vm158_vm2 = vcmask 257024   ;;  %s269_s1 = inlined_call_operand.vmem [shape: bf16[32,32], index: 1, kind: input, shape index: {}]   ;;  %s270_s0 = inlined_call_operand.vmem [shape: bf16[16,32], index: 0, kind: input, shape index: {}]   ;;  %s271_s3 = inlined_call_operand.vmem [shape: bf16[16,32], index: 3, kind: input, shape index: {}]   ;;  %s272_s2 = inlined_call_operand.vmem [shape: f32[1,32], index: 2, kind: input, shape index: {}]   ;;  %s273_s4 = inlined_call_operand.vmem [shape: f32[1,32], index: 4, kind: input, shape index: {}]   ;;  %s274_s5 = inlined_call_operand.vmem [shape: f32[1,32], index: 5, kind: input, shape index: {}]   ;;  %s275_s6 = inlined_call_operand.vmem [shape: bf16[16,32], index: 6, kind: output, shape index: {}]  }
   0x1   :  { %183 = vmatprep.subr.bf16.mxu0 %v200_v0  ;;  %v193_v1 = vld [vmem:[%s269_s1] sm:$0xff]   ;;  %187 = vmatprep.mubr.msk.bf16.mxu0 %vm201_vm0, %v200_v0  ;;  %v194_v2 = vld [vmem:[%s269_s1 + $0x8] sm:$0xff]  }
   0x2   :  { %184 = vmatpush3.bf16.msra.mxu0 %v193_v1  ;;  %v195_v3 = vld [vmem:[%s270_s0] sm:$0xff]  }
   0x3   :  { %185 = vmatprep.subr.bf16.mxu0 %v200_v0  ;;  %v177_v4 = vld [vmem:[%s271_s3] sm:$0xff]  }
   0x4   :  { %v165_v5 = vld [vmem:[%s272_s2] ss:$0 sm:$0xff]  ;;  %v178_v6 = vunpack.c.l.bf16 %v177_v4  ;;  %v179_v10 = vunpack.c.h.bf16 %v177_v4 }
   0x5   :  { %v170_v35 = vld [vmem:[%s273_s4] ss:$0 sm:$0xff] }
   0x6   :  { %186 = vmatpush3.bf16.msra.mxu0 %v194_v2  ;;  %v171_v37 = vld [vmem:[%s274_s5] ss:$0 sm:$0xff] }
   0x9   :  { %188 = vmatmul.mubr.msk.bf16.vlgmr.msra.gmra.mrb[0].mxu0 %vm54_vm1, %v195_v3 }
  0xdc   :  { %v92_v7 = vpop.f32.mrb[0].mxu0 }
  0xdd   :  { %v93_v8 = vadd.f32 %v165_v5, %v92_v7  ;;  %v189_v9 = vpop.f32.mrb[1].mxu0 }
  0xde   :  { %v95_v11 = vpop.f32.mrb[2].mxu0 }
  0xdf   :  { %v96_v12 = vadd.f32 %v165_v5, %v95_v11  ;;  %v190_v13 = vpop.f32.mrb[3].mxu0  ;;  %v103_v14 = vadd.f32 %v178_v6, %v93_v8 }
  0xe1   :  { %v105_v15 = vsel %vm54_vm1, %v103_v14, 0.0  ;;  %v104_v16 = vadd.f32 %v179_v10, %v96_v12 }
  0xe2   :  { %106 = vadd.xlane.f32.xlu0 %v105_v15 }
  0xe3   :  { %v108_v17 = vsel %vm54_vm1, %v104_v16, 0.0 }
  0xe6   :  { %109 = vadd.xlane.f32.xlu0 %v108_v17 }
 0x16f   :  { %v107_v18 = vpop.xlane.xlu0 %106 }
 0x170   :  { %v112_v19 = vmul.f32 0.03125, %v107_v18 }
 0x172   :  { %v114_v20 = vsub.f32 %v103_v14, %v112_v19 }
 0x173   :  { %v110_v21 = vpop.xlane.xlu0 %109 }
 0x174   :  { %v113_v22 = vmul.f32 0.03125, %v110_v21  ;;  %v116_v23 = vmul.f32 %v114_v20, %v114_v20 }
 0x176   :  { %v115_v24 = vsub.f32 %v104_v16, %v113_v22  ;;  %v118_v25 = vsel %vm54_vm1, %v116_v23, 0.0 }
 0x177   :  { %119 = vadd.xlane.f32.xlu1 %v118_v25 }
 0x178   :  { %v117_v26 = vmul.f32 %v115_v24, %v115_v24 }
 0x17a   :  { %v121_v27 = vsel %vm54_vm1, %v117_v26, 0.0 }
 0x17b   :  { %122 = vadd.xlane.f32.xlu1 %v121_v27 }
 0x204   :  { %v120_v28 = vpop.xlane.xlu1 %119 }
 0x205   :  { %v124_v29 = vmul.f32 0.03125, %v120_v28 }
 0x207   :  { %v126_v30 = vadd.f32 1e-12, %v124_v29 }
 0x208   :  { %v123_v31 = vpop.xlane.xlu1 %122 }
 0x209   :  { %196 = vrsqrt.f32 %v126_v30  ;;  %v125_v32 = vmul.f32 0.03125, %v123_v31 }
 0x20b   :  { %v127_v33 = vadd.f32 1e-12, %v125_v32 }
 0x20d   :  { %198 = vrsqrt.f32 %v127_v33 }
 0x213   :  { %v197_v34 = vpop.eup %196 }
 0x214   :  { %v130_v36 = vmul.f32 %v197_v34, %v114_v20 }
 0x216   :  { %v139_v38 = vmul.f32 %v170_v35, %v130_v36 }
 0x217   :  { %v199_v39 = vpop.eup %198 }
 0x218   :  { %v148_v40 = vadd.f32 %v171_v37, %v139_v38  ;;  %v131_v41 = vmul.f32 %v199_v39, %v115_v24 }
 0x21a   :  { %v174_v42 = vpack.c.bf16 %v148_v40, %v148_v40  ;;  %v140_v43 = vmul.f32 %v170_v35, %v131_v41 }
 0x21c   :  { %159 = vst.msk [vmem:[%s275_s6] sm:$0xf] %vm158_vm2, %v174_v42  ;;  %v149_v44 = vadd.f32 %v171_v37, %v140_v43 }
 0x21e   :  { %v175_v45 = vpack.c.bf16 %v149_v44, %v149_v44 }
 0x220   :  { %160 = vst.msk [vmem:[%s275_s6 + $0x4] sm:$0xf] %vm158_vm2, %v175_v45 }

// kernel: bert_classifier_forward.14
= control target key start
LH: loop header
LB: loop body
LE: loop exit
PB: predicated region body
PF: predicated region fallthrough
CT: control target
= control target key end

     0   :  { %s728_s12 = smov 0   ;;  %s730_s13 = smov 0   ;;  %s800_s0 = inlined_call_operand.vmem [shape: bf16[2,8,96], index: 0, kind: input, shape index: {}, may-alias: {0,1}]   ;;  %s801_s1 = inlined_call_operand.vmem [shape: bf16[2,8,96], index: 1, kind: input, shape index: {}, may-alias: {0,1}]   ;;  %s802_s2 = inlined_call_operand.vmem [shape: f32[2,1,8], index: 2, kind: input, shape index: {}]   ;;  %s803_s3 = inlined_call_operand.vmem [shape: bf16[2,8,32], index: 3, kind: output, shape index: {}]  }
   0x1   :  { %s732_s14 = smov 0  }
   0x2 LB: > { %s25_s15 = sadd.s32 1, %s694_s13  ;;  %p585_p0 = scmp.ge.s32.totalorder %s698_s14, 1  ;;  %s698_s14 = sphi %s732_s14, %s13_s14   ;;  %s694_s13 = sphi %s730_s13, %s805_s13   ;;  %s690_s12 = sphi %s728_s12, %s804_s12  }
   0x3   : > { %p27_p1 = scmp.ge.s32.totalorder %s25_s15, 2  ;;  %p172_p2 = scmp.lt.s32.totalorder %s698_s14, 3 }
   0x5   : > { %s807_s15 = smov (%p27_p1, %s25_s15), 0  ;;  %p173_p3 = pnand %p585_p0, %p172_p2 }
   0x6   : > { %p207_p4 = scmp.lt.s32.totalorder (!%p173_p3), %s690_s12, 1  ;;  %v700_v0 = vmov (!%p173_p3), 0.0   ;;  %vm701_vm0 = vmmov (!%p173_p3), 0   ;;  %s702_s23 = smov (!%p173_p3), 96   ;;  %vm237_vm1 = vcmask (!%p173_p3), 130048   ;;  %vm292_vm2 = vcmask (!%p173_p3), 64512  }
   0x7   : > { %176 = sbr.rel (%p173_p3) target bundleno = 1543 (0x607), region = 32  ;;  %609 = vmatprep.subr.bf16.mxu0 (!%p173_p3), %v700_v0  ;;  %611 = vmatprep.mubr.msk.bf16.mxu0 (!%p173_p3), %vm701_vm0, %v700_v0  ;;  %s703_s24 = smov (!%p173_p3), 64   ;;  %vm310_vm3 = vcmask (!%p173_p3), 1043456   ;;  %vm355_vm4 = vcmask (!%p173_p3), 125952   ;;  %vm484_vm5 = vcmask (!%p173_p3), 257152  }
   0x8   : > { %615 = vmatprep.subr.bf16.mxu1 (!%p173_p3), %v700_v0  ;;  %617 = vmatprep.mubr.msk.bf16.mxu1 (!%p173_p3), %vm701_vm0, %v700_v0  ;;  %s704_s28 = smov (!%p173_p3), 80   ;;  %s705_s29 = smov (!%p173_p3), 112  }
   0x9   : > { %s706_s6 = smov (!%p173_p3), 48   ;;  %s707_s7 = smov (!%p173_p3), 16  }
   0xe   : > { %s809_s12 = smov (!%p207_p4, %s690_s12), 1 }
   0xf   : > { %s748_s16 = sshll.u32 %s809_s12, 2  ;;  %s220_s27 = scalar_lea.vmem %s802_s2, %s809_s12 }
  0x10   : > { %s754_s19 = scalar_lea.vmem %s801_s1, %s748_s16  ;;  %s761_s22 = scalar_lea.vmem %s800_s0, %s748_s16  ;;  %v591_v6 = vld [vmem:[%s220_s27] ss:$0 sm:$0xff] }
  0x11   : > { %v665_v1 = vld [vmem:[%s754_s19] ss:$0 sps:$4 sm:$0xff]   ;;  %s783_s5 = scalar_lea.vmem %s803_s3, %s748_s16 }
  0x12   : > { %235 = vrot.lane.b32.xlu0 %v665_v1, %s702_s23  ;;  %v230_v4 = vld [vmem:[%s761_s22] sm:$0xf]  ;;  %305 = vrot.lane.b32.xlu1 %v665_v1, %s703_s24 }
  0x13   : > { %v666_v20 = vld [vmem:[%s754_s19] ss:$0 sps:$4 sm:$0xff]  }
  0x14   : > { %v667_v21 = vld [vmem:[%s761_s22] ss:$0 sps:$4 sm:$0xff]  }
  0x84   : > { %v236_v2 = vpop.permute.xlu0 %235  ;;  %v306_v13 = vpop.permute.xlu1 %305 }
  0x85   : > { %v242_v3 = vsel %vm237_vm1, %v236_v2, 0  ;;  %v312_v14 = vsel %vm310_vm3, %v306_v13, 0 }
  0x86   : > { %610 = vmatpush3.bf16.xpose.msra.mxu0 %v242_v3  ;;  %616 = vmatpush3.bf16.msra.mxu1 %v312_v14 }
  0x87   : > { %627 = vmatprep.subr.bf16.mxu0 %v700_v0  ;;  %621 = vmatprep.subr.bf16.mxu1 %v700_v0 }
  0x8d   : > { %612 = vmatmul.mubr.msk.bf16.vlgmr.msra.gmra.mrb[0].mxu0 %vm237_vm1, %v230_v4 }
  0x8e   : > { %629 = vmatprep.mubr.msk.bf16.mxu0 %vm701_vm0, %v700_v0 }
 0x160   : > { %v278_v5 = vpop.f32.mrb[0].mxu0 }
 0x161   : > { %v284_v7 = vmul.f32 0.25, %v278_v5  ;;  %v613_v8 = vpop.f32.mrb[1].mxu0 }
 0x162   : > { %v281_v9 = vpop.f32.mrb[2].mxu0 }
 0x163   : > { %v614_v10 = vpop.f32.mrb[3].mxu0  ;;  %v291_v11 = vadd.f32 %v591_v6, %v284_v7 }
 0x165   : > { %v293_v12 = vsel %vm292_vm2, %v291_v11, -inf }
 0x166   : > { %294 = vmax.xlane.f32.xlu0 %v293_v12 }
 0x1f3   : > { %v295_v15 = vpop.xlane.xlu0 %294 }
 0x1f4   : > { %v296_v16 = vsub.f32 %v291_v11, %v295_v15 }
 0x1f6   : > { %v297_v17 = vmul.f32 1.442695, %v296_v16 }
 0x1f8   : > { %668 = vpow2.f32 %v297_v17 }
 0x202   : > { %v669_v18 = vpop.eup %668 }
 0x203   : > { %v299_v19 = vsel %vm292_vm2, %v669_v18, 0.0 }
 0x204   : > { %300 = vadd.xlane.f32.xlu1 %v299_v19 }
 0x215   : > { %367 = vrot.lane.b32.xlu1 %v666_v20, %s704_s28 }
 0x219   : > { %362 = vrot.lane.b32.xlu1 %v667_v21, %s705_s29 }
 0x291   : > { %v301_v22 = vpop.xlane.xlu1 %300 }
 0x292   : > { %670 = vrcp.f32 %v301_v22 }
 0x295   : > { %v368_v24 = vpop.permute.xlu1 %367 }
 0x296   : > { %v373_v26 = vsel %vm237_vm1, %v368_v24, 0 }
 0x299   : > { %v363_v28 = vpop.permute.xlu1 %362 }
 0x29c   : > { %v671_v23 = vpop.eup %670 }
 0x29d   : > { %v303_v25 = vmul.f32 %v671_v23, %v669_v18 }
 0x29f   : > { %v304_v27 = vpack.c.bf16 %v303_v25, %v303_v25 }
 0x2a1   : > { %618 = vmatmul.mubr.msk.bf16.vlgmr.msra.gmra.mrb[0].mxu1 %vm292_vm2, %v304_v27 }
 0x2a2   : > { %622 = vmatpush3.bf16.xpose.msra.mxu1 %v373_v26  ;;  %623 = vmatprep.mubr.msk.bf16.mxu1 %vm701_vm0, %v700_v0 }
 0x2a9   : > { %624 = vmatmul.mubr.msk.bf16.vlgmr.msra.gmra.mrb[4].mxu1 %vm237_vm1, %v363_v28 }
 0x374   : > { %v348_v29 = vpop.f32.mrb[0].mxu1 }
 0x375   : > { %v354_v30 = vpack.c.bf16 %v348_v29, %v348_v29  ;;  %v619_v31 = vpop.f32.mrb[1].mxu1 }
 0x376   : > { %v351_v32 = vpop.f32.mrb[2].mxu1 }
 0x377   : > { %356 = vst.msk [vmem:[%s783_s5] sm:$0xf] %vm355_vm4, %v354_v30  ;;  %v620_v33 = vpop.f32.mrb[3].mxu1 }
 0x37c   : > { %v409_v34 = vpop.f32.mrb[4].mxu1 }
 0x37d   : > { %v415_v35 = vmul.f32 0.25, %v409_v34  ;;  %v625_v36 = vpop.f32.mrb[5].mxu1 }
 0x37e   : > { %v412_v37 = vpop.f32.mrb[6].mxu1 }
 0x37f   : > { %v626_v38 = vpop.f32.mrb[7].mxu1  ;;  %v416_v39 = vadd.f32 %v591_v6, %v415_v35 }
 0x381   : > { %v417_v40 = vsel %vm292_vm2, %v416_v39, -inf }
 0x382   : > { %418 = vmax.xlane.f32.xlu1 %v417_v40 }
 0x40f   : > { %v419_v41 = vpop.xlane.xlu1 %418 }
 0x410   : > { %v420_v42 = vsub.f32 %v416_v39, %v419_v41 }
 0x412   : > { %v421_v43 = vmul.f32 1.442695, %v420_v42 }
 0x414   : > { %672 = vpow2.f32 %v421_v43 }
 0x41e   : > { %v673_v44 = vpop.eup %672 }
 0x41f   : > { %v423_v45 = vsel %vm292_vm2, %v673_v44, 0.0 }
 0x420   : > { %424 = vadd.xlane.f32.xlu0 %v423_v45 }
 0x436   : > { %429 = vrot.lane.b32.xlu0 %v666_v20, %s706_s6 }
 0x4ad   : > { %v425_v46 = vpop.xlane.xlu0 %424 }
 0x4ae   : > { %674 = vrcp.f32 %v425_v46 }
 0x4b1   : > { %v430_v47 = vpop.permute.xlu0 %429 }
 0x4b2   : > { %v435_v48 = vsel %vm310_vm3, %v430_v47, 0 }
 0x4b3   : > { %628 = vmatpush3.bf16.msra.mxu0 %v435_v48 }
 0x4b8   : > { %v675_v49 = vpop.eup %674 }
 0x4b9   : > { %v427_v50 = vmul.f32 %v675_v49, %v673_v44 }
 0x4bb   : > { %v428_v51 = vpack.c.bf16 %v427_v50, %v427_v50 }
 0x4bd   : > { %630 = vmatmul.mubr.msk.bf16.vlgmr.msra.gmra.mrb[4].mxu0 %vm292_vm2, %v428_v51 }
 0x590   : > { %v471_v52 = vpop.f32.mrb[4].mxu0 }
 0x591   : > { %v600_v53 = vpack.c.bf16 %v471_v52, %v471_v52  ;;  %v631_v54 = vpop.f32.mrb[5].mxu0 }
 0x592   : > { %v474_v55 = vpop.f32.mrb[6].mxu0 }
 0x593   : > { %481 = vrot.lane.b32.xlu0 %v600_v53, %s707_s7  ;;  %v632_v56 = vpop.f32.mrb[7].mxu0 }
 0x605   : > { %v482_v57 = vpop.permute.xlu0 %481 }
 0x606   : > { %485 = vst.msk [vmem:[%s783_s5] sm:$0xf] %vm484_vm5, %v482_v57 }
 0x607 PF: > { %s13_s14 = sadd.s32 1, %s698_s14   ;;  %s804_s12 = smov %s694_s13 }
 0x608   : > { %p10_p5 = scmp.ge.s32.totalorder %s13_s14, 4   ;;  %s805_s13 = smov %s807_s15 }
 0x60a   :  { %12 = sbr.rel (!%p10_p5) target bundleno = 2 (0x2), region = 68 }

// kernel: bert_classifier_forward.16
= control target key start
LH: loop header
LB: loop body
LE: loop exit
PB: predicated region body
PF: predicated region fallthrough
CT: control target
= control target key end

     0   :  { %v144_v0 = vmov 0.0   ;;  %vm145_vm0 = vmmov 0   ;;  %vm45_vm1 = vcmask 261120   ;;  %vm108_vm2 = vcmask 519168   ;;  %s184_s1 = inlined_call_operand.vmem [shape: bf16[32,64], index: 1, kind: input, shape index: {}]   ;;  %s185_s0 = inlined_call_operand.vmem [shape: bf16[16,32], index: 0, kind: input, shape index: {}]   ;;  %s186_s2 = inlined_call_operand.vmem [shape: f32[1,64], index: 2, kind: input, shape index: {}]   ;;  %s187_s3 = inlined_call_operand.vmem [shape: bf16[16,64], index: 3, kind: output, shape index: {}]  }
   0x1   :  { %127 = vmatprep.subr.bf16.mxu0 %v144_v0  ;;  %v137_v1 = vld [vmem:[%s184_s1] sm:$0xff]   ;;  %131 = vmatprep.mubr.msk.bf16.mxu0 %vm145_vm0, %v144_v0  ;;  %v138_v2 = vld [vmem:[%s184_s1 + $0x8] sm:$0xff]  }
   0x2   :  { %128 = vmatpush3.bf16.msra.mxu0 %v137_v1  ;;  %v139_v3 = vld [vmem:[%s185_s0] sm:$0xff]  }
   0x3   :  { %129 = vmatprep.subr.bf16.mxu0 %v144_v0  ;;  %v115_v4 = vld [vmem:[%s186_s2] ss:$0 sm:$0xff] }
   0x6   :  { %130 = vmatpush3.bf16.msra.mxu0 %v138_v2 }
   0x9   :  { %132 = vmatmul.mubr.msk.bf16.vlgmr.msra.gmra.mrb[0].mxu0 %vm45_vm1, %v139_v3 }
  0xdc   :  { %v83_v5 = vpop.f32.mrb[0].mxu0 }
  0xdd   :  { %v84_v6 = vadd.f32 %v115_v4, %v83_v5  ;;  %v133_v7 = vpop.f32.mrb[1].mxu0 }
  0xde   :  { %v86_v8 = vpop.f32.mrb[2].mxu0 }
  0xdf   :  { %v92_v9 = vmul.f32 0.70710677, %v84_v6  ;;  %v87_v10 = vadd.f32 %v115_v4, %v86_v8  ;;  %v134_v11 = vpop.f32.mrb[3].mxu0  ;;  %v90_v14 = vmul.f32 0.5, %v84_v6 }
  0xe1   :  { %140 = verf.f32 %v92_v9  ;;  %v93_v12 = vmul.f32 0.70710677, %v87_v10  ;;  %v91_v18 = vmul.f32 0.5, %v87_v10 }
  0xe3   :  { %142 = verf.f32 %v93_v12 }
  0xeb   :  { %v141_v13 = vpop.eup %140 }
  0xec   :  { %v96_v15 = vadd.f32 1.0, %v141_v13 }
  0xed   :  { %v143_v16 = vpop.eup %142 }
  0xee   :  { %v98_v17 = vmul.f32 %v96_v15, %v90_v14  ;;  %v97_v19 = vadd.f32 1.0, %v143_v16 }
  0xf0   :  { %v122_v20 = vpack.c.bf16 %v98_v17, %v98_v17  ;;  %v99_v21 = vmul.f32 %v97_v19, %v91_v18 }
  0xf2   :  { %109 = vst.msk [vmem:[%s187_s3] sm:$0xf] %vm108_vm2, %v122_v20  ;;  %v123_v22 = vpack.c.bf16 %v99_v21, %v99_v21 }
  0xf4   :  { %110 = vst.msk [vmem:[%s187_s3 + $0x4] sm:$0xf] %vm108_vm2, %v123_v22 }

// kernel: bert_classifier_forward.17
= control target key start
LH: loop header
LB: loop body
LE: loop exit
PB: predicated region body
PF: predicated region fallthrough
CT: control target
= control target key end

     0   :  { %v227_v0 = vmov 0.0   ;;  %vm228_vm0 = vmmov 0   ;;  %vm70_vm1 = vcmask 523264   ;;  %vm121_vm2 = vcmask 261120   ;;  %s301_s1 = inlined_call_operand.vmem [shape: bf16[64,32], index: 1, kind: input, shape index: {}]   ;;  %s302_s0 = inlined_call_operand.vmem [shape: bf16[16,64], index: 0, kind: input, shape index: {}]   ;;  %s303_s3 = inlined_call_operand.vmem [shape: bf16[16,32], index: 3, kind: input, shape index: {}]   ;;  %s304_s2 = inlined_call_operand.vmem [shape: f32[1,32], index: 2, kind: input, shape index: {}]   ;;  %s305_s4 = inlined_call_operand.vmem [shape: f32[1,32], index: 4, kind: input, shape index: {}]   ;;  %s306_s5 = inlined_call_operand.vmem [shape: f32[1,32], index: 5, kind: input, shape index: {}]   ;;  %s307_s6 = inlined_call_operand.vmem [shape: bf16[16,32], index: 6, kind: output, shape index: {}]  }
   0x1   :  { %204 = vmatprep.subr.bf16.mxu0 %v227_v0  ;;  %v218_v1 = vld [vmem:[%s301_s1] sm:$0xff]   ;;  %212 = vmatprep.mubr.msk.bf16.mxu0 %vm228_vm0, %v227_v0  ;;  %v219_v2 = vld [vmem:[%s301_s1 + $0x8] sm:$0xff]   ;;  %v220_v3 = vld [vmem:[%s301_s1 + $0x10] sm:$0xff]   ;;  %vm175_vm3 = vcmask 257024  }
   0x2   :  { %205 = vmatpush3.bf16.msra.mxu0 %v218_v1  ;;  %v221_v4 = vld [vmem:[%s301_s1 + $0x18] sm:$0xff]   ;;  %v222_v5 = vld [vmem:[%s302_s0] sm:$0xff]  }
   0x3   :  { %206 = vmatprep.subr.bf16.mxu0 %v227_v0  ;;  %v196_v6 = vld [vmem:[%s303_s3] sm:$0xff]  }
   0x4   :  { %v182_v7 = vld [vmem:[%s304_s2] ss:$0 sm:$0xff]  ;;  %v197_v8 = vunpack.c.l.bf16 %v196_v6  ;;  %v198_v12 = vunpack.c.h.bf16 %v196_v6 }
   0x5   :  { %v189_v37 = vld [vmem:[%s305_s4] ss:$0 sm:$0xff] }
   0x6   :  { %207 = vmatpush3.bf16.msra.mxu0 %v219_v2  ;;  %v190_v39 = vld [vmem:[%s306_s5] ss:$0 sm:$0xff] }
   0x7   :  { %208 = vmatprep.subr.bf16.mxu0 %v227_v0 }
   0xa   :  { %209 = vmatpush3.bf16.msra.mxu0 %v220_v3 }
   0xb   :  { %210 = vmatprep.subr.bf16.mxu0 %v227_v0 }
   0xe   :  { %211 = vmatpush3.bf16.msra.mxu0 %v221_v4 }
  0x11   :  { %213 = vmatmul.mubr.msk.bf16.vlgmr.msra.gmra.mrb[0].mxu0 %vm70_vm1, %v222_v5 }
  0xe4   :  { %v108_v9 = vpop.f32.mrb[0].mxu0 }
  0xe5   :  { %v109_v10 = vadd.f32 %v182_v7, %v108_v9  ;;  %v214_v11 = vpop.f32.mrb[1].mxu0 }
  0xe6   :  { %v111_v13 = vpop.f32.mrb[2].mxu0 }
  0xe7   :  { %v112_v14 = vadd.f32 %v182_v7, %v111_v13  ;;  %v215_v15 = vpop.f32.mrb[3].mxu0  ;;  %v119_v16 = vadd.f32 %v197_v8, %v109_v10 }
  0xe9   :  { %v122_v17 = vsel %vm121_vm2, %v119_v16, 0.0  ;;  %v120_v18 = vadd.f32 %v198_v12, %v112_v14 }
  0xea   :  { %123 = vadd.xlane.f32.xlu0 %v122_v17 }
  0xeb   :  { %v125_v19 = vsel %vm121_vm2, %v120_v18, 0.0 }
  0xee   :  { %126 = vadd.xlane.f32.xlu0 %v125_v19 }
 0x177   :  { %v124_v20 = vpop.xlane.xlu0 %123 }
 0x178   :  { %v129_v21 = vmul.f32 0.03125, %v124_v20 }
 0x17a   :  { %v131_v22 = vsub.f32 %v119_v16, %v129_v21 }
 0x17b   :  { %v127_v23 = vpop.xlane.xlu0 %126 }
 0x17c   :  { %v130_v24 = vmul.f32 0.03125, %v127_v23  ;;  %v133_v25 = vmul.f32 %v131_v22, %v131_v22 }
 0x17e   :  { %v132_v26 = vsub.f32 %v120_v18, %v130_v24  ;;  %v135_v27 = vsel %vm121_vm2, %v133_v25, 0.0 }
 0x17f   :  { %136 = vadd.xlane.f32.xlu1 %v135_v27 }
 0x180   :  { %v134_v28 = vmul.f32 %v132_v26, %v132_v26 }
 0x182   :  { %v138_v29 = vsel %vm121_vm2, %v134_v28, 0.0 }
 0x183   :  { %139 = vadd.xlane.f32.xlu1 %v138_v29 }
 0x20c   :  { %v137_v30 = vpop.xlane.xlu1 %136 }
 0x20d   :  { %v141_v31 = vmul.f32 0.03125, %v137_v30 }
 0x20f   :  { %v143_v32 = vadd.f32 1e-12, %v141_v31 }
 0x210   :  { %v140_v33 = vpop.xlane.xlu1 %139 }
 0x211   :  { %223 = vrsqrt.f32 %v143_v32  ;;  %v142_v34 = vmul.f32 0.03125, %v140_v33 }
 0x213   :  { %v144_v35 = vadd.f32 1e-12, %v142_v34 }
 0x215   :  { %225 = vrsqrt.f32 %v144_v35 }
 0x21b   :  { %v224_v36 = vpop.eup %223 }
 0x21c   :  { %v147_v38 = vmul.f32 %v224_v36, %v131_v22 }
 0x21e   :  { %v156_v40 = vmul.f32 %v189_v37, %v147_v38 }
 0x21f   :  { %v226_v41 = vpop.eup %225 }
 0x220   :  { %v165_v42 = vadd.f32 %v190_v39, %v156_v40  ;;  %v148_v43 = vmul.f32 %v226_v41, %v132_v26 }
 0x222   :  { %v193_v44 = vpack.c.bf16 %v165_v42, %v165_v42  ;;  %v157_v45 = vmul.f32 %v189_v37, %v148_v43 }
 0x224   :  { %176 = vst.msk [vmem:[%s307_s6] sm:$0xf] %vm175_vm3, %v193_v44  ;;  %v166_v46 = vadd.f32 %v190_v39, %v157_v45 }
 0x226   :  { %v194_v47 = vpack.c.bf16 %v166_v46, %v166_v46 }
 0x228   :  { %177 = vst.msk [vmem:[%s307_s6 + $0x4] sm:$0xf] %vm175_vm3, %v194_v47 }

// kernel: bert_classifier_forward.23
= control target key start
LH: loop header
LB: loop body
LE: loop exit
PB: predicated region body
PF: predicated region fallthrough
CT: control target
= control target key end

     0   :  { %v281_v3 = vmov 0.0|0.0   ;;  %vm282_vm0 = vmmov 0   ;;  %v283_v6 = vmov 0.0   ;;  %s354_s0 = inlined_call_operand.vmem [shape: bf16[2,32], index: 0, kind: input, shape index: {}]   ;;  %s355_s1 = inlined_call_operand.vmem [shape: f32[32,16], index: 1, kind: input, shape index: {}]   ;;  %s356_s2 = inlined_call_operand.vmem [shape: f32[1,16], index: 2, kind: input, shape index: {}]   ;;  %s357_s3 = inlined_call_operand.vmem [shape: f32[16,4], index: 3, kind: input, shape index: {}]   ;;  %s358_s4 = inlined_call_operand.vmem [shape: f32[1,4], index: 4, kind: input, shape index: {}]   ;;  %s359_s5 = inlined_call_operand.hbm [shape: f32[2,4], index: 5, kind: output, shape index: {}]  }
   0x1   :  { %v23_v0 = vld [vmem:[%s355_s1] sm:$0xff]  ;;  %v24_v1 = vld [vmem:[%s355_s1 + $0x8] sm:$0xff]  ;;  %v25_v2 = vld [vmem:[%s355_s1 + $0x10] sm:$0xff]  ;;  %242 = vmatprep.subr.bf16.mxu0 %v281_v3  ;;  %232 = vmatprep.mubr.msk.f32.mxu0 %vm282_vm0, %v283_v6 }
   0x2   :  { %v243_v4 = vpack.c.bf16 %v24_v1, %v23_v0  ;;  %v26_v5 = vld [vmem:[%s355_s1 + $0x18] sm:$0xff]  ;;  %248 = vmatprep.subr.bf16.mxu1 %v281_v3  ;;  %239 = vmatprep.mubr.msk.f32.mxu1 %vm282_vm0, %v283_v6 }
   0x3   :  { %10 = vsyncpa [#allocation3], 0  ;;  %v246_v7 = vpack.c.bf16 %v26_v5, %v25_v2  ;;  %v21_v8 = vld [vmem:[%s354_s0] sm:$0x1]  ;;  %vm34_vm1 = vcmask 261120   ;;  %v114_v11 = vld [vmem:[%s357_s3 + $0x8] sm:$0xff] }
   0x4   :  { %244 = vmatpush3.bf16.msra.mxu0 %v243_v4  ;;  %v22_v9 = vunpack.c.l.bf16 %v21_v8  ;;  %v113_v10 = vld [vmem:[%s357_s3] sm:$0xff]  ;;  %vm122_vm2 = vcmask 130048   ;;  %s284_s3 = smov [#allocation2]   ;;  %vm196_vm3 = vcmask 25600  }
   0x5   :  { %245 = vmatprep.subr.bf16.mxu0 %v281_v3  ;;  %v249_v12 = vpack.c.bf16 %v114_v11, %v113_v10  ;;  %v212_v13 = vld [vmem:[%s356_s2] ss:$0 sm:$0xff]  ;;  %s204_s9 = sshll.u32 %s284_s3, 4  ;;  %s205_s9 = int_to_ptr.vmem [resolvable:$true] %s204_s9 }
   0x6   :  { %v214_v22 = vld [vmem:[%s358_s4] ss:$0 sm:$0xff]  ;;  %s257_s2 = scalar_lea.vmem %s205_s9, 32  ;;  %p262_p1 = scmp.lt.s32.totalorder %s205_s9, %s205_s9 }
   0x7   :  { %250 = vmatpush3.bf16.msra.mxu1 %v249_v12  ;;  %p258_p0 = scmp.ne.s32.totalorder %s205_s9, %s257_s2  ;;  %p263_p2 = scmp.lt.s32.totalorder %s257_s2, %s257_s2 }
   0x8   :  { %247 = vmatpush3.bf16.msra.mxu0 %v246_v7 }
   0x9   :  { %p264_p3 = por %p263_p2, %p262_p1 }
   0xb   :  { %233 = vmatmul.mubr.msk.f32.vlgmr.msra.gmra.mrb[0].mxu0 %vm34_vm1, %v22_v9  ;;  %p265_p4 = pnand %p264_p3, %p258_p0 }
  0xde   :  { %v104_v14 = vpop.f32.mrb[0].mxu0 }
  0xdf   :  { %v105_v15 = vadd.f32 %v212_v13, %v104_v14  ;;  %v234_v16 = vpop.f32.mrb[1].mxu0 }
  0xe1   :  { %v109_v17 = vmul.f32 0.70710677, %v105_v15  ;;  %v108_v19 = vmul.f32 0.5, %v105_v15 }
  0xe3   :  { %255 = verf.f32 %v109_v17 }
  0xed   :  { %v256_v18 = vpop.eup %255 }
  0xee   :  { %v111_v20 = vadd.f32 1.0, %v256_v18 }
  0xf0   :  { %v112_v21 = vmul.f32 %v111_v20, %v108_v19 }
  0xf2   :  { %240 = vmatmul.mubr.msk.f32.vlgmr.msra.gmra.mrb[0].mxu1 %vm122_vm2, %v112_v21 }
 0x1c5   :  { %v192_v23 = vpop.f32.mrb[0].mxu1 }
 0x1c6   :  { %v193_v24 = vadd.f32 %v214_v22, %v192_v23  ;;  %v241_v25 = vpop.f32.mrb[1].mxu1 }
 0x1c8   :  { %197 = vst.msk [vmem:[#allocation2] sm:$0x3] %vm196_vm3, %v193_v24 }
 0x1c9   :  { %268 = shalt.err (!%p265_p4)
}
 0x1ca   :  { %s269_s12 = scalar_lea.hbm %s359_s5, 32 }
 0x1cb   :  { %p270_p5 = scmp.ne.s32.totalorder %s359_s5, %s269_s12  ;;  %p273_p6 = scmp.lt.u32.totalorder %s269_s12, %s359_s5 }
 0x1cd   :  { %p275_p7 = pnand %p273_p6, %p270_p5 }
 0x1cf   :  { %278 = shalt.err (!%p275_p7)
}
 0x1d0   :  { %207 = dma.vmem_to_hbm [thread:$0]  %s205_s9, 32, %s359_s5, [#allocation3]  }
 0x1d1   :  { %279 = dma.done.wait [#allocation3], 32  }
 0x1d2   :  { %280 = vsyncadd [#allocation3], 4294967264 }
 0x1d3   :  { %211 = vsyncpa [#allocation3], 1 }

</bundles_post_ra>
